<compile_context>
chip_gen: v7x
topology: tpu7x:2x2x1
jax: 0.10.0
libtpu: 0.0.40
codegen_flags: <defaults>
</compile_context>

<pallas_src>
import functools

import jax
import jax.numpy as jnp
from jax.experimental import pallas as pl
from jax.experimental.pallas import tpu as pltpu

_LANE = 128
_SUBLANE = 8


def _round_up(n, m):
    return ((n + m - 1) // m) * m


def _pad2d(a, rows, cols):
    pr, pc = rows - a.shape[0], cols - a.shape[1]
    if pr == 0 and pc == 0:
        return a
    return jnp.pad(a, ((0, pr), (0, pc)))


def _vmem_cap_bytes():
    """Generation-aware VMEM cap: ~75% of physical VMEM, conservative fallback."""
    try:
        cap = int(pltpu.get_tpu_info().vmem_capacity_bytes)
        return max((cap * 3) // 4, 32 << 20)   # ~48 MiB on v7x, ~96 MiB on v5e/v6e
    except Exception:
        return 48 << 20                        # safe on every generation


def _ffnn_kernel(n_hidden, *refs):
    # refs = (x, w_h0, b_h0, ..., w_h{n-1}, b_h{n-1}, w_out, b_out, out)
    x_ref = refs[0]
    out_ref = refs[-1]
    params = refs[1:-1]

    h = x_ref[...]                      # (TB, F) -- feature dim NOT lane-padded
    # TODO(synk): for deep stacks, switch to stacked (n_hidden, H, H) weights +
    # lax.fori_loop instead of this Python-unrolled loop.
    for i in range(n_hidden):
        w = params[2 * i][...]          # (K, H_pad), compute dtype
        b = params[2 * i + 1][...]      # (1, H_pad), f32
        acc = jnp.dot(h.astype(w.dtype), w, preferred_element_type=jnp.float32)
        # dropout (eval mode) == identity; bias add + ReLU in f32 on the VPU.
        h = jnp.maximum(acc + b, 0.0)

    w_out = params[-2][...]             # (H_pad, C_pad), compute dtype
    b_out = params[-1][...]             # (1, C_pad), f32, padded cols = -1e30
    logits = jnp.dot(h.astype(w_out.dtype), w_out,
                     preferred_element_type=jnp.float32) + b_out

    # Padded class columns carry a -1e30 bias (and exactly-0 matmul contribution
    # from zero-padded weight columns), so exp() underflows to 0 and the
    # log-sum-exp is exact -- no per-tile mask work needed.
    m = jnp.max(logits, axis=-1, keepdims=True)
    z = logits - m
    lse = jnp.log(jnp.sum(jnp.exp(z), axis=-1, keepdims=True))
    out_ref[...] = (z - lse).astype(out_ref.dtype)


def prepare_params(hidden_weights, hidden_biases, w_out, b_out, *,
                   compute_dtype=jnp.bfloat16):
    """Pad + cast parameters ONCE, outside the per-call path (reused across calls)."""
    n_hidden = len(hidden_weights)
    input_size, hidden_dim = hidden_weights[0].shape
    num_classes = w_out.shape[1]
    h_pad = _round_up(hidden_dim, _LANE)
    c_pad = _round_up(num_classes, _LANE)

    args = []
    for i, (w, b) in enumerate(zip(hidden_weights, hidden_biases)):
        k_in = input_size if i == 0 else h_pad    # layer-0 K dim stays unpadded
        args.append(_pad2d(w, k_in, h_pad).astype(compute_dtype))
        args.append(_pad2d(b.reshape(1, -1), 1, h_pad).astype(jnp.float32))
    args.append(_pad2d(w_out, h_pad, c_pad).astype(compute_dtype))

    # Output bias: real classes keep their bias; padded classes get -1e30 so the
    # padded logit columns never affect max / log-sum-exp (mask folded into bias).
    b_out_f32 = b_out.reshape(1, -1).astype(jnp.float32)
    if c_pad > num_classes:
        mask_cols = jnp.full((1, c_pad - num_classes), -1e30, jnp.float32)
        b_out_p = jnp.concatenate([b_out_f32, mask_cols], axis=1)
    else:
        b_out_p = b_out_f32
    args.append(b_out_p)

    return dict(args=tuple(args), n_hidden=n_hidden, input_size=input_size,
                hidden_dim=hidden_dim, num_classes=num_classes,
                h_pad=h_pad, c_pad=c_pad, compute_dtype=compute_dtype)


def feedforward_nn(x, prepared, *, block_batch=512, out_dtype=jnp.float32):
    """Forward pass of FeedForwardNN inside one batch-tiled Pallas kernel."""
    batch, input_size = x.shape
    assert input_size == prepared["input_size"]
    n_hidden = prepared["n_hidden"]
    h_pad, c_pad = prepared["h_pad"], prepared["c_pad"]
    num_classes = prepared["num_classes"]
    param_args = prepared["args"]
    compute_dtype = prepared["compute_dtype"]

    # Batch tile: multiple of 8 sublanes, <= block_batch, and >= 2 grid steps so
    # the "parallel" axis can split across both TensorCores on v7x.
    tb = min(block_batch, _round_up(batch, _SUBLANE))
    tb = max(_SUBLANE, (tb // _SUBLANE) * _SUBLANE)
    while tb > _SUBLANE and pl.cdiv(batch, tb) < 2:
        tb = max(_SUBLANE, ((tb // 2) // _SUBLANE) * _SUBLANE)
    b_pad = _round_up(batch, tb)
    grid = (b_pad // tb,)

    # x: only the batch dim is padded (to a tile multiple) -- a no-op when batch
    # is already aligned.  The feature dim stays unpadded.
    x_p = _pad2d(x, b_pad, input_size).astype(compute_dtype)

    def build_in_specs(weight_mode):
        specs = [pl.BlockSpec((tb, input_size), lambda i: (i, 0))]
        for a in param_args:
            if weight_mode is None:
                specs.append(pl.BlockSpec(a.shape, lambda i: (0, 0)))
            else:
                specs.append(pl.BlockSpec(a.shape, lambda i: (0, 0),
                                          pipeline_mode=weight_mode))
        return specs

    out_specs = pl.BlockSpec((tb, c_pad), lambda i: (i, 0))   # lane-dense writeback

    # Cost estimate consistent with the padded dims the kernel actually executes.
    dims = [input_size] + [h_pad] * n_hidden + [c_pad]
    flops = 2 * b_pad * sum(dims[i] * dims[i + 1] for i in range(len(dims) - 1))
    out_itemsize = jnp.dtype(out_dtype).itemsize
    bytes_accessed = int(x_p.nbytes + sum(a.nbytes for a in param_args)
                         + b_pad * c_pad * out_itemsize)
    cost = pl.CostEstimate(flops=int(flops),
                           transcendentals=int(b_pad * c_pad),
                           bytes_accessed=bytes_accessed)

    # VMEM budget: resident weights (headroom for the 2x-buffered fallback),
    # double-buffered x/out tiles, f32 activation slabs, fixed margin.
    weight_bytes = sum(a.nbytes for a in param_args)
    tile_bytes = x_p.dtype.itemsize * tb * input_size + out_itemsize * tb * c_pad
    act_bytes = 4 * 4 * tb * max(h_pad, c_pad)
    est = 2 * weight_bytes + 2 * tile_bytes + act_bytes + (4 << 20)
    vmem_limit = int(min(max(est, 32 << 20), _vmem_cap_bytes()))

    kernel = functools.partial(_ffnn_kernel, n_hidden)

    def run(in_specs):
        return pl.pallas_call(
            kernel,
            out_shape=jax.ShapeDtypeStruct((b_pad, c_pad), out_dtype),
            grid=grid,
            in_specs=in_specs,
            out_specs=out_specs,
            compiler_params=pltpu.CompilerParams(
                dimension_semantics=("parallel",),
                vmem_limit_bytes=vmem_limit),
            cost_estimate=cost,
        )(x_p, *param_args)

    # Grid-invariant weights/biases only need a single VMEM buffer; fall back to
    # default double-buffered specs if this jax build rejects Buffered(1).
    try:
        out_padded = run(build_in_specs(pl.Buffered(1)))
    except Exception:
        out_padded = run(build_in_specs(None))

    # TODO(synk): weight-streaming path (layer grid axis / pltpu.emit_pipeline)
    # for models whose resident weights exceed the v7x VMEM budget.
    return out_padded[:batch, :num_classes]


def init_params(key, input_size, num_classes, num_hidden, hidden_dim):
    """Deterministic PyTorch-Linear-style init: U(-1/sqrt(fan_in), 1/sqrt(fan_in))."""
    assert num_hidden > 0
    hidden_weights, hidden_biases = [], []
    dims = [input_size] + [hidden_dim] * num_hidden
    for i in range(num_hidden):
        fan_in = dims[i]
        key, kw, kb = jax.random.split(key, 3)
        bound = 1.0 / jnp.sqrt(fan_in)
        # stored as [in_dim, out_dim] (already transposed vs torch's [out, in])
        hidden_weights.append(
            jax.random.uniform(kw, (dims[i], dims[i + 1]), jnp.float32, -bound, bound))
        hidden_biases.append(
            jax.random.uniform(kb, (1, dims[i + 1]), jnp.float32, -bound, bound))
    key, kw, kb = jax.random.split(key, 3)
    bound = 1.0 / jnp.sqrt(hidden_dim)
    w_out = jax.random.uniform(kw, (hidden_dim, num_classes), jnp.float32, -bound, bound)
    b_out = jax.random.uniform(kb, (1, num_classes), jnp.float32, -bound, bound)
    return hidden_weights, hidden_biases, w_out, b_out


if __name__ == "__main__":
    # Small shapes consistent with the module's forward.
    batch = 256
    input_size = 16
    hidden_dim = 32
    num_classes = 10
    num_hidden = 2
    dropout = 0.1  # eval-mode dropout -> identity

    key = jax.random.PRNGKey(0)
    key, kx = jax.random.split(key)
    x = jax.random.normal(kx, (batch, input_size), jnp.float32)

    hidden_weights, hidden_biases, w_out, b_out = init_params(
        key, input_size, num_classes, num_hidden, hidden_dim)

    # --- f32 path (exact vs reference) -------------------------------------
    params_f32 = prepare_params(hidden_weights, hidden_biases, w_out, b_out,
                                compute_dtype=jnp.float32)
    out = feedforward_nn(x, params_f32, block_batch=512)
    out = jax.block_until_ready(out)

    h = x
    for w, b in zip(hidden_weights, hidden_biases):
        h = jnp.maximum(h @ w + b, 0.0)
    ref = jax.nn.log_softmax(h @ w_out + b_out, axis=-1)
    assert out.shape == (batch, num_classes)
    assert jnp.allclose(out, ref, atol=1e-4, rtol=1e-4), "f32 mismatch vs reference"

    # --- bf16 matmul-input path (default; MXU-native on all generations) ----
    params_bf16 = prepare_params(hidden_weights, hidden_biases, w_out, b_out)
    out_bf16 = feedforward_nn(x, params_bf16, block_batch=512)
    out_bf16 = jax.block_until_ready(out_bf16)

    hb = x.astype(jnp.bfloat16)
    for w, b in zip(hidden_weights, hidden_biases):
        acc = jnp.dot(hb, w.astype(jnp.bfloat16),
                      preferred_element_type=jnp.float32) + b
        hb = jnp.maximum(acc, 0.0).astype(jnp.bfloat16)
    logits_b = jnp.dot(hb, w_out.astype(jnp.bfloat16),
                       preferred_element_type=jnp.float32) + b_out
    ref_b = jax.nn.log_softmax(logits_b, axis=-1)
    assert out_bf16.shape == (batch, num_classes)
    assert jnp.allclose(out_bf16, ref_b, atol=2e-3, rtol=2e-3), "bf16 mismatch vs reference"

    print("KERNEL_OK")
</pallas_src>

<mosaic_0001>
module attributes {stable_mosaic.version = 11 : i64} {
  func.func @_ffnn_kernel(%arg0: i32, %arg1: memref<128x16xf32, #tpu.memory_space<vmem>>, %arg2: memref<16x128xf32, #tpu.memory_space<vmem>>, %arg3: memref<1x128xf32, #tpu.memory_space<vmem>>, %arg4: memref<128x128xf32, #tpu.memory_space<vmem>>, %arg5: memref<1x128xf32, #tpu.memory_space<vmem>>, %arg6: memref<128x128xf32, #tpu.memory_space<vmem>>, %arg7: memref<1x128xf32, #tpu.memory_space<vmem>>, %arg8: memref<128x128xf32, #tpu.memory_space<vmem>>) attributes {dimension_semantics = [#tpu.dimension_semantics<parallel>], iteration_bounds = array<i64: 2>, scalar_prefetch = 0 : i64, scratch_operands = 0 : i64, tpu.core_type = #tpu.core_type<tc>, window_params = [{transform_indices = @transform_0, window_bounds = array<i64: 128, 16>}, {pipeline_mode = #tpu.pipeline_mode<synchronous>, transform_indices = @transform_1, window_bounds = array<i64: 16, 128>}, {pipeline_mode = #tpu.pipeline_mode<synchronous>, transform_indices = @transform_2, window_bounds = array<i64: 1, 128>}, {pipeline_mode = #tpu.pipeline_mode<synchronous>, transform_indices = @transform_3, window_bounds = array<i64: 128, 128>}, {pipeline_mode = #tpu.pipeline_mode<synchronous>, transform_indices = @transform_4, window_bounds = array<i64: 1, 128>}, {pipeline_mode = #tpu.pipeline_mode<synchronous>, transform_indices = @transform_5, window_bounds = array<i64: 128, 128>}, {pipeline_mode = #tpu.pipeline_mode<synchronous>, transform_indices = @transform_6, window_bounds = array<i64: 1, 128>}, {transform_indices = @transform_7, window_bounds = array<i64: 128, 128>}]} {
    %c0 = arith.constant 0 : index
    %c0_0 = arith.constant 0 : index
    %0 = vector.load %arg1[%c0, %c0_0] : memref<128x16xf32, #tpu.memory_space<vmem>>, vector<128x16xf32>
    %c0_1 = arith.constant 0 : index
    %c0_2 = arith.constant 0 : index
    %1 = vector.load %arg2[%c0_1, %c0_2] : memref<16x128xf32, #tpu.memory_space<vmem>>, vector<16x128xf32>
    %c0_3 = arith.constant 0 : index
    %c0_4 = arith.constant 0 : index
    %2 = vector.load %arg3[%c0_3, %c0_4] : memref<1x128xf32, #tpu.memory_space<vmem>>, vector<1x128xf32>
    %cst = arith.constant dense<0.000000e+00> : vector<128x128xf32>
    %3 = tpu.matmul %0, %1, %cst {dimension_numbers = #tpu.dot_dimension_numbers<[1], [0], [0], [1], [0, 0, 1, 1], [], []>} : vector<128x16xf32>, vector<16x128xf32>, vector<128x128xf32> -> vector<128x128xf32>
    %4 = vector.broadcast %2 : vector<1x128xf32> to vector<128x128xf32>
    %5 = arith.addf %3, %4 : vector<128x128xf32>
    %cst_5 = arith.constant 0.000000e+00 : f32
    %6 = vector.broadcast %cst_5 : f32 to vector<128x128xf32>
    %7 = arith.maximumf %5, %6 : vector<128x128xf32>
    %c0_6 = arith.constant 0 : index
    %c0_7 = arith.constant 0 : index
    %8 = vector.load %arg4[%c0_6, %c0_7] : memref<128x128xf32, #tpu.memory_space<vmem>>, vector<128x128xf32>
    %c0_8 = arith.constant 0 : index
    %c0_9 = arith.constant 0 : index
    %9 = vector.load %arg5[%c0_8, %c0_9] : memref<1x128xf32, #tpu.memory_space<vmem>>, vector<1x128xf32>
    %cst_10 = arith.constant dense<0.000000e+00> : vector<128x128xf32>
    %10 = tpu.matmul %7, %8, %cst_10 {dimension_numbers = #tpu.dot_dimension_numbers<[1], [0], [0], [1], [0, 0, 1, 1], [], []>} : vector<128x128xf32>, vector<128x128xf32>, vector<128x128xf32> -> vector<128x128xf32>
    %11 = vector.broadcast %9 : vector<1x128xf32> to vector<128x128xf32>
    %12 = arith.addf %10, %11 : vector<128x128xf32>
    %cst_11 = arith.constant 0.000000e+00 : f32
    %13 = vector.broadcast %cst_11 : f32 to vector<128x128xf32>
    %14 = arith.maximumf %12, %13 : vector<128x128xf32>
    %c0_12 = arith.constant 0 : index
    %c0_13 = arith.constant 0 : index
    %15 = vector.load %arg6[%c0_12, %c0_13] : memref<128x128xf32, #tpu.memory_space<vmem>>, vector<128x128xf32>
    %c0_14 = arith.constant 0 : index
    %c0_15 = arith.constant 0 : index
    %16 = vector.load %arg7[%c0_14, %c0_15] : memref<1x128xf32, #tpu.memory_space<vmem>>, vector<1x128xf32>
    %cst_16 = arith.constant dense<0.000000e+00> : vector<128x128xf32>
    %17 = tpu.matmul %14, %15, %cst_16 {dimension_numbers = #tpu.dot_dimension_numbers<[1], [0], [0], [1], [0, 0, 1, 1], [], []>} : vector<128x128xf32>, vector<128x128xf32>, vector<128x128xf32> -> vector<128x128xf32>
    %18 = vector.broadcast %16 : vector<1x128xf32> to vector<128x128xf32>
    %19 = arith.addf %17, %18 : vector<128x128xf32>
    %cst_17 = arith.constant dense<0xFF800000> : vector<128xf32>
    %20 = vector.multi_reduction <maximumf>, %19, %cst_17 [1] : vector<128x128xf32> to vector<128xf32>
    %21 = vector.shape_cast %20 : vector<128xf32> to vector<128x1xf32>
    %22 = vector.broadcast %21 : vector<128x1xf32> to vector<128x128xf32>
    %23 = arith.subf %19, %22 : vector<128x128xf32>
    %24 = math.exp %23 : vector<128x128xf32>
    %cst_18 = arith.constant dense<0.000000e+00> : vector<128xf32>
    %25 = vector.multi_reduction <add>, %24, %cst_18 [1] : vector<128x128xf32> to vector<128xf32>
    %26 = vector.shape_cast %25 : vector<128xf32> to vector<128x1xf32>
    %27 = math.log %26 : vector<128x1xf32>
    %28 = vector.broadcast %27 : vector<128x1xf32> to vector<128x128xf32>
    %29 = arith.subf %23, %28 : vector<128x128xf32>
    %c0_19 = arith.constant 0 : index
    %c0_20 = arith.constant 0 : index
    %30 = vector.load %arg8[%c0_19, %c0_20] : memref<128x128xf32, #tpu.memory_space<vmem>>, vector<128x128xf32>
    tpu.vector_store %arg8[%c0_19, %c0_20], %29 {strides = array<i32>} : memref<128x128xf32, #tpu.memory_space<vmem>>, vector<128x128xf32>,
    return
  }
  func.func @transform_0(%arg0: i32) -> (i32, i32) {
    %c0_i32 = arith.constant 0 : i32
    %c0_i32_0 = arith.constant 0 : i32
    return %arg0, %c0_i32 : i32, i32
  }
  func.func @transform_1(%arg0: i32) -> (i32, i32) {
    %c0_i32 = arith.constant 0 : i32
    %c0_i32_0 = arith.constant 0 : i32
    %c0_i32_1 = arith.constant 0 : i32
    return %c0_i32, %c0_i32_0 : i32, i32
  }
  func.func @transform_2(%arg0: i32) -> (i32, i32) {
    %c0_i32 = arith.constant 0 : i32
    %c0_i32_0 = arith.constant 0 : i32
    %c0_i32_1 = arith.constant 0 : i32
    return %c0_i32, %c0_i32_0 : i32, i32
  }
  func.func @transform_3(%arg0: i32) -> (i32, i32) {
    %c0_i32 = arith.constant 0 : i32
    %c0_i32_0 = arith.constant 0 : i32
    %c0_i32_1 = arith.constant 0 : i32
    return %c0_i32, %c0_i32_0 : i32, i32
  }
  func.func @transform_4(%arg0: i32) -> (i32, i32) {
    %c0_i32 = arith.constant 0 : i32
    %c0_i32_0 = arith.constant 0 : i32
    %c0_i32_1 = arith.constant 0 : i32
    return %c0_i32, %c0_i32_0 : i32, i32
  }
  func.func @transform_5(%arg0: i32) -> (i32, i32) {
    %c0_i32 = arith.constant 0 : i32
    %c0_i32_0 = arith.constant 0 : i32
    %c0_i32_1 = arith.constant 0 : i32
    return %c0_i32, %c0_i32_0 : i32, i32
  }
  func.func @transform_6(%arg0: i32) -> (i32, i32) {
    %c0_i32 = arith.constant 0 : i32
    %c0_i32_0 = arith.constant 0 : i32
    %c0_i32_1 = arith.constant 0 : i32
    return %c0_i32, %c0_i32_0 : i32, i32
  }
  func.func @transform_7(%arg0: i32) -> (i32, i32) {
    %c0_i32 = arith.constant 0 : i32
    %c0_i32_0 = arith.constant 0 : i32
    return %arg0, %c0_i32 : i32, i32
  }
}

module attributes {stable_mosaic.version = 11 : i64} {
  func.func @_ffnn_kernel(%arg0: i32, %arg1: memref<128x16xf32, #tpu.memory_space<vmem>>, %arg2: memref<16x128xf32, #tpu.memory_space<vmem>>, %arg3: memref<1x128xf32, #tpu.memory_space<vmem>>, %arg4: memref<128x128xf32, #tpu.memory_space<vmem>>, %arg5: memref<1x128xf32, #tpu.memory_space<vmem>>, %arg6: memref<128x128xf32, #tpu.memory_space<vmem>>, %arg7: memref<1x128xf32, #tpu.memory_space<vmem>>, %arg8: memref<128x128xf32, #tpu.memory_space<vmem>>) attributes {dimension_semantics = [#tpu.dimension_semantics<parallel>], iteration_bounds = array<i64: 2>, scalar_prefetch = 0 : i64, scratch_operands = 0 : i64, tpu.core_type = #tpu.core_type<tc>, window_params = [{transform_indices = @transform_0, window_bounds = array<i64: 128, 16>}, {pipeline_mode = #tpu.pipeline_mode<synchronous>, transform_indices = @transform_1, window_bounds = array<i64: 16, 128>}, {pipeline_mode = #tpu.pipeline_mode<synchronous>, transform_indices = @transform_2, window_bounds = array<i64: 1, 128>}, {pipeline_mode = #tpu.pipeline_mode<synchronous>, transform_indices = @transform_3, window_bounds = array<i64: 128, 128>}, {pipeline_mode = #tpu.pipeline_mode<synchronous>, transform_indices = @transform_4, window_bounds = array<i64: 1, 128>}, {pipeline_mode = #tpu.pipeline_mode<synchronous>, transform_indices = @transform_5, window_bounds = array<i64: 128, 128>}, {pipeline_mode = #tpu.pipeline_mode<synchronous>, transform_indices = @transform_6, window_bounds = array<i64: 1, 128>}, {transform_indices = @transform_7, window_bounds = array<i64: 128, 128>}]} {
    %c0 = arith.constant 0 : index
    %c0_0 = arith.constant 0 : index
    %0 = vector.load %arg1[%c0, %c0_0] : memref<128x16xf32, #tpu.memory_space<vmem>>, vector<128x16xf32>
    %c0_1 = arith.constant 0 : index
    %c0_2 = arith.constant 0 : index
    %1 = vector.load %arg2[%c0_1, %c0_2] : memref<16x128xf32, #tpu.memory_space<vmem>>, vector<16x128xf32>
    %c0_3 = arith.constant 0 : index
    %c0_4 = arith.constant 0 : index
    %2 = vector.load %arg3[%c0_3, %c0_4] : memref<1x128xf32, #tpu.memory_space<vmem>>, vector<1x128xf32>
    %cst = arith.constant dense<0.000000e+00> : vector<128x128xf32>
    %3 = tpu.matmul %0, %1, %cst {dimension_numbers = #tpu.dot_dimension_numbers<[1], [0], [0], [1], [0, 0, 1, 1], [], []>} : vector<128x16xf32>, vector<16x128xf32>, vector<128x128xf32> -> vector<128x128xf32>
    %4 = vector.broadcast %2 : vector<1x128xf32> to vector<128x128xf32>
    %5 = arith.addf %3, %4 : vector<128x128xf32>
    %cst_5 = arith.constant 0.000000e+00 : f32
    %6 = vector.broadcast %cst_5 : f32 to vector<128x128xf32>
    %7 = arith.maximumf %5, %6 : vector<128x128xf32>
    %c0_6 = arith.constant 0 : index
    %c0_7 = arith.constant 0 : index
    %8 = vector.load %arg4[%c0_6, %c0_7] : memref<128x128xf32, #tpu.memory_space<vmem>>, vector<128x128xf32>
    %c0_8 = arith.constant 0 : index
    %c0_9 = arith.constant 0 : index
    %9 = vector.load %arg5[%c0_8, %c0_9] : memref<1x128xf32, #tpu.memory_space<vmem>>, vector<1x128xf32>
    %cst_10 = arith.constant dense<0.000000e+00> : vector<128x128xf32>
    %10 = tpu.matmul %7, %8, %cst_10 {dimension_numbers = #tpu.dot_dimension_numbers<[1], [0], [0], [1], [0, 0, 1, 1], [], []>} : vector<128x128xf32>, vector<128x128xf32>, vector<128x128xf32> -> vector<128x128xf32>
    %11 = vector.broadcast %9 : vector<1x128xf32> to vector<128x128xf32>
    %12 = arith.addf %10, %11 : vector<128x128xf32>
    %cst_11 = arith.constant 0.000000e+00 : f32
    %13 = vector.broadcast %cst_11 : f32 to vector<128x128xf32>
    %14 = arith.maximumf %12, %13 : vector<128x128xf32>
    %c0_12 = arith.constant 0 : index
    %c0_13 = arith.constant 0 : index
    %15 = vector.load %arg6[%c0_12, %c0_13] : memref<128x128xf32, #tpu.memory_space<vmem>>, vector<128x128xf32>
    %c0_14 = arith.constant 0 : index
    %c0_15 = arith.constant 0 : index
    %16 = vector.load %arg7[%c0_14, %c0_15] : memref<1x128xf32, #tpu.memory_space<vmem>>, vector<1x128xf32>
    %cst_16 = arith.constant dense<0.000000e+00> : vector<128x128xf32>
    %17 = tpu.matmul %14, %15, %cst_16 {dimension_numbers = #tpu.dot_dimension_numbers<[1], [0], [0], [1], [0, 0, 1, 1], [], []>} : vector<128x128xf32>, vector<128x128xf32>, vector<128x128xf32> -> vector<128x128xf32>
    %18 = vector.broadcast %16 : vector<1x128xf32> to vector<128x128xf32>
    %19 = arith.addf %17, %18 : vector<128x128xf32>
    %cst_17 = arith.constant dense<0xFF800000> : vector<128xf32>
    %20 = vector.multi_reduction <maximumf>, %19, %cst_17 [1] : vector<128x128xf32> to vector<128xf32>
    %21 = vector.shape_cast %20 : vector<128xf32> to vector<128x1xf32>
    %22 = vector.broadcast %21 : vector<128x1xf32> to vector<128x128xf32>
    %23 = arith.subf %19, %22 : vector<128x128xf32>
    %24 = math.exp %23 : vector<128x128xf32>
    %cst_18 = arith.constant dense<0.000000e+00> : vector<128xf32>
    %25 = vector.multi_reduction <add>, %24, %cst_18 [1] : vector<128x128xf32> to vector<128xf32>
    %26 = vector.shape_cast %25 : vector<128xf32> to vector<128x1xf32>
    %27 = math.log %26 : vector<128x1xf32>
    %28 = vector.broadcast %27 : vector<128x1xf32> to vector<128x128xf32>
    %29 = arith.subf %23, %28 : vector<128x128xf32>
    %c0_19 = arith.constant 0 : index
    %c0_20 = arith.constant 0 : index
    %30 = vector.load %arg8[%c0_19, %c0_20] : memref<128x128xf32, #tpu.memory_space<vmem>>, vector<128x128xf32>
    tpu.vector_store %arg8[%c0_19, %c0_20], %29 {strides = array<i32>} : memref<128x128xf32, #tpu.memory_space<vmem>>, vector<128x128xf32>,
    return
  }
  func.func @transform_0(%arg0: i32) -> (i32, i32) {
    %c0_i32 = arith.constant 0 : i32
    %c0_i32_0 = arith.constant 0 : i32
    return %arg0, %c0_i32 : i32, i32
  }
  func.func @transform_1(%arg0: i32) -> (i32, i32) {
    %c0_i32 = arith.constant 0 : i32
    %c0_i32_0 = arith.constant 0 : i32
    %c0_i32_1 = arith.constant 0 : i32
    return %c0_i32, %c0_i32_0 : i32, i32
  }
  func.func @transform_2(%arg0: i32) -> (i32, i32) {
    %c0_i32 = arith.constant 0 : i32
    %c0_i32_0 = arith.constant 0 : i32
    %c0_i32_1 = arith.constant 0 : i32
    return %c0_i32, %c0_i32_0 : i32, i32
  }
  func.func @transform_3(%arg0: i32) -> (i32, i32) {
    %c0_i32 = arith.constant 0 : i32
    %c0_i32_0 = arith.constant 0 : i32
    %c0_i32_1 = arith.constant 0 : i32
    return %c0_i32, %c0_i32_0 : i32, i32
  }
  func.func @transform_4(%arg0: i32) -> (i32, i32) {
    %c0_i32 = arith.constant 0 : i32
    %c0_i32_0 = arith.constant 0 : i32
    %c0_i32_1 = arith.constant 0 : i32
    return %c0_i32, %c0_i32_0 : i32, i32
  }
  func.func @transform_5(%arg0: i32) -> (i32, i32) {
    %c0_i32 = arith.constant 0 : i32
    %c0_i32_0 = arith.constant 0 : i32
    %c0_i32_1 = arith.constant 0 : i32
    return %c0_i32, %c0_i32_0 : i32, i32
  }
  func.func @transform_6(%arg0: i32) -> (i32, i32) {
    %c0_i32 = arith.constant 0 : i32
    %c0_i32_0 = arith.constant 0 : i32
    %c0_i32_1 = arith.constant 0 : i32
    return %c0_i32, %c0_i32_0 : i32, i32
  }
  func.func @transform_7(%arg0: i32) -> (i32, i32) {
    %c0_i32 = arith.constant 0 : i32
    %c0_i32_0 = arith.constant 0 : i32
    return %arg0, %c0_i32 : i32, i32
  }
}

</mosaic_0001>

<bundles_post_ra>
// kernel: tpu_custom_call.1
= control target key start
LH: loop header
LB: loop body
LE: loop exit
PB: predicated region body
PF: predicated region fallthrough
CT: control target
= control target key end

     0   :  { %12 = vsyncpa [#allocation3], 0  ;;  %s2003_s0 = inlined_call_operand.vmem [shape: f32[256,16], index: 0, kind: input, shape index: {}]   ;;  %s2004_s1 = inlined_call_operand.vmem [shape: f32[16,128], index: 1, kind: input, shape index: {}]   ;;  %s2005_s2 = inlined_call_operand.vmem [shape: f32[1,128], index: 2, kind: input, shape index: {}]   ;;  %s2006_s3 = inlined_call_operand.vmem [shape: f32[128,128], index: 3, kind: input, shape index: {}]   ;;  %s2007_s4 = inlined_call_operand.vmem [shape: f32[1,128], index: 4, kind: input, shape index: {}]   ;;  %s2008_s5 = inlined_call_operand.vmem [shape: f32[128,128], index: 5, kind: input, shape index: {}]   ;;  %s2009_s6 = inlined_call_operand.vmem [shape: f32[1,128], index: 6, kind: input, shape index: {}]   ;;  %s2010_s7 = inlined_call_operand.hbm [shape: f32[256,128], index: 7, kind: output, shape index: {}]  }
   0x1   :  { %14 = vsyncpa [#allocation3 + $0x1], 0  ;;  %s1653_s24 = smov 0   ;;  %s1655_s25 = smov 0  }
   0x2   :  { %s1657_s26 = smov 0   ;;  %s1659_s27 = smov 0  }
   0x3 LB: > { %s1674_s28 = sadd.s32 4294967295, %s1608_s27   ;;  %s1119_s29 = sadd.s32 4294967294, %s1608_s27   ;;  %s1608_s27 = sphi %s1659_s27, %s2016_s27   ;;  %s1604_s26 = sphi %s1657_s26, %s2015_s26   ;;  %s1600_s25 = sphi %s1655_s25, %s2014_s25   ;;  %s1596_s24 = sphi %s1653_s24, %s2013_s24  }
   0x4   : > { %s1678_s30 = sadd.s32 1, %s1608_s27   ;;  %s179_s8 = sadd.s32 1, %s1604_s26 }
   0x5   : > { %s176_s9 = ssub.s32 %s1608_s27, %s1678_s30  ;;  %p189_p0 = scmp.ne.s32.totalorder %s1604_s26, %s1600_s25 }
   0x6   : > { %p177_p1 = scmp.eq.s32.totalorder %s176_s9, 0  ;;  %p190_p2 = scmp.eq.s32.totalorder %s1674_s28, 1 }
   0x7   : > { %p195_p3 = scmp.ne.s32.totalorder %s1600_s25, %s1596_s24  ;;  %p196_p4 = scmp.eq.s32.totalorder %s1119_s29, 1 }
   0x8   : > { %s1689_s10 = scalar_select %p177_p1, %s1604_s26, %s179_s8  }
   0x9   : > { %p1691_p5 = por %p190_p2, %p189_p0  ;;  %p1695_p6 = por %p196_p4, %p195_p3 }
   0xa   : > { %p1122_p7 = scmp.ge.s32.totalorder %s1608_s27, 1  ;;  %p241_p8 = scmp.lt.s32.totalorder %s1608_s27, 3 }
   0xc   : > { %p242_p9 = pnand %p1122_p7, %p241_p8 }
   0xd   : > { %v296_v0 = vld [vmem:[%s2004_s1] sm:$0xff] (!%p242_p9)  ;;  %v297_v1 = vld [vmem:[%s2004_s1 + $0x8] sm:$0xff] (!%p242_p9)  ;;  %s1124_s17 = sshll.u32 (!%p242_p9), %s1674_s28, 4  ;;  %v517_v5 = vld [vmem:[%s2006_s3 + $0x10] sm:$0xff] (!%p242_p9)  ;;  %vm305_vm0 = vcmask (!%p242_p9), 130048   ;;  %s1150_s9 = sshll.u32 (!%p242_p9), %s1674_s28, 11 }
   0xe   : > { %245 = sbr.rel (%p242_p9) target bundleno = 1038 (0x40e), region = 48  ;;  %v515_v2 = vld [vmem:[%s2006_s3] sm:$0xff] (!%p242_p9)  ;;  %v1373_v3 = vpack.c.bf16 (!%p242_p9), %v297_v1, %v296_v0  ;;  %p274_p10 = scmp.lt.s32.totalorder (!%p242_p9), %s1124_s17, 31  ;;  %v516_v4 = vld [vmem:[%s2006_s3 + $0x8] sm:$0xff] (!%p242_p9)  ;;  %v518_v6 = vld [vmem:[%s2006_s3 + $0x18] sm:$0xff] (!%p242_p9) }
   0xf   : > { %v1377_v7 = vpack.c.bf16 (!%p242_p9), %v516_v4, %v515_v2  ;;  %v1381_v8 = vpack.c.bf16 (!%p242_p9), %v518_v6, %v517_v5  ;;  %v519_v9 = vld [vmem:[%s2006_s3 + $0x20] sm:$0xff] (!%p242_p9)  ;;  %v520_v10 = vld [vmem:[%s2006_s3 + $0x28] sm:$0xff] (!%p242_p9)  ;;  %v521_v12 = vld [vmem:[%s2006_s3 + $0x30] sm:$0xff] (!%p242_p9)  ;;  %s1610_s18 = smov (!%p242_p9), [#allocation2]  }
  0x10   : > { %1374 = vmatprep.subr.bf16.mxu0 (!%p242_p9), %v1373_v3  ;;  %v1385_v11 = vpack.c.bf16 (!%p242_p9), %v520_v10, %v519_v9  ;;  %v522_v13 = vld [vmem:[%s2006_s3 + $0x38] sm:$0xff] (!%p242_p9)  ;;  %v523_v20 = vld [vmem:[%s2006_s3 + $0x40] sm:$0xff] (!%p242_p9)  ;;  %v524_v21 = vld [vmem:[%s2006_s3 + $0x48] sm:$0xff] (!%p242_p9)  ;;  %s1550_s19 = sshll.u32 (!%p242_p9), %s1610_s18, 4  ;;  %s1551_s19 = int_to_ptr.vmem [resolvable:$false] %s1550_s19 }
  0x11   : > { %1376 = vmatpush3.bf16.msra.mxu0 (!%p242_p9), %v1373_v3  ;;  %1378 = vmatprep.subr.bf16.mxu1 (!%p242_p9), %v1377_v7  ;;  %v1389_v18 = vpack.c.bf16 (!%p242_p9), %v522_v13, %v521_v12  ;;  %v1393_v23 = vpack.c.bf16 (!%p242_p9), %v524_v21, %v523_v20  ;;  %v525_v25 = vld [vmem:[%s2006_s3 + $0x50] sm:$0xff] (!%p242_p9)  ;;  %v526_v26 = vld [vmem:[%s2006_s3 + $0x58] sm:$0xff] (!%p242_p9)  ;;  %v527_v30 = vld [vmem:[%s2006_s3 + $0x60] sm:$0xff] (!%p242_p9)  ;;  %s1552_s21 = scalar_lea.vmem (!%p242_p9), %s1551_s19, 4096 }
  0x12   : > { %1380 = vmatpush3.bf16.msra.mxu1 (!%p242_p9), %v1377_v7  ;;  %v1397_v28 = vpack.c.bf16 (!%p242_p9), %v526_v26, %v525_v25  ;;  %v528_v31 = vld [vmem:[%s2006_s3 + $0x68] sm:$0xff] (!%p242_p9)  ;;  %v529_v40 = vld [vmem:[%s2006_s3 + $0x70] sm:$0xff] (!%p242_p9)  ;;  %v530_v41 = vld [vmem:[%s2006_s3 + $0x78] sm:$0xff] (!%p242_p9) }
  0x13   : > { %1382 = vmatprep.subr.bf16.mxu1 (!%p242_p9), %v1381_v8  ;;  %v1401_v33 = vpack.c.bf16 (!%p242_p9), %v528_v31, %v527_v30  ;;  %v1405_v42 = vpack.c.bf16 (!%p242_p9), %v530_v41, %v529_v40  ;;  %v699_v43 = vld [vmem:[%s2008_s5] sm:$0xff] (!%p242_p9)  ;;  %v700_v44 = vld [vmem:[%s2008_s5 + $0x8] sm:$0xff] (!%p242_p9)  ;;  %v701_v45 = vld [vmem:[%s2008_s5 + $0x10] sm:$0xff] (!%p242_p9) }
  0x14   : > { %v1409_v46 = vpack.c.bf16 (!%p242_p9), %v700_v44, %v699_v43  ;;  %v702_v47 = vld [vmem:[%s2008_s5 + $0x18] sm:$0xff] (!%p242_p9)  ;;  %v703_v49 = vld [vmem:[%s2008_s5 + $0x20] sm:$0xff] (!%p242_p9)  ;;  %v704_v50 = vld [vmem:[%s2008_s5 + $0x28] sm:$0xff] (!%p242_p9) }
  0x15   : > { %s2018_s17 = smov (!%p274_p10, %s1124_s17), 31  ;;  %v1413_v48 = vpack.c.bf16 %v702_v47, %v701_v45  ;;  %v1417_v51 = vpack.c.bf16 %v704_v50, %v703_v49  ;;  %v705_v52 = vld [vmem:[%s2008_s5 + $0x30] sm:$0xff]  ;;  %v706_v53 = vld [vmem:[%s2008_s5 + $0x38] sm:$0xff]  ;;  %v707_v55 = vld [vmem:[%s2008_s5 + $0x40] sm:$0xff] }
  0x16   : > { %s1125_s16 = sshll.u32 %s2018_s17, 3  ;;  %1384 = vmatpush3.bf16.msra.mxu1 %v1381_v8  ;;  %1410 = vmatprep.subr.bf16.mxu0 %v1409_v46  ;;  %v1421_v54 = vpack.c.bf16 %v706_v53, %v705_v52  ;;  %v708_v56 = vld [vmem:[%s2008_s5 + $0x48] sm:$0xff]  ;;  %v709_v58 = vld [vmem:[%s2008_s5 + $0x50] sm:$0xff]  ;;  %v710_v59 = vld [vmem:[%s2008_s5 + $0x58] sm:$0xff]  ;;  %s270_s17 = sand.u32 1, %s1600_s25  }
  0x17   : > { %s1729_s20 = scalar_lea.vmem %s2003_s0, %s1125_s16  ;;  %1386 = vmatprep.subr.bf16.mxu1 %v1385_v11  ;;  %v1425_v57 = vpack.c.bf16 %v708_v56, %v707_v55  ;;  %v1429_v60 = vpack.c.bf16 %v710_v59, %v709_v58  ;;  %v711_v61 = vld [vmem:[%s2008_s5 + $0x60] sm:$0xff]  ;;  %v712_v62 = vld [vmem:[%s2008_s5 + $0x68] sm:$0xff]  ;;  %v713_v49 = vld [vmem:[%s2008_s5 + $0x70] sm:$0xff]  ;;  %s1123_s29 = sshll.u32 %s270_s17, 7 }
  0x18   : > { %v280_v14 = vld [vmem:[%s1729_s20] sm:$0xff]  ;;  %v281_v15 = vld [vmem:[%s1729_s20 + $0x8] sm:$0xff]  ;;  %v282_v16 = vld [vmem:[%s1729_s20 + $0x10] sm:$0xff]  ;;  %v1433_v63 = vpack.c.bf16 %v712_v62, %v711_v61  ;;  %s1918_s8 = scalar_lea.vmem [#allocation2], %s1123_s29  ;;  %s1953_s16 = scalar_lea.hbm %s2010_s7, %s1150_s9 }
  0x19   : > { %1237 = vmatprep.mubr.msk.f32.mxu0 %vm305_vm0, %v280_v14  ;;  %v283_v17 = vld [vmem:[%s1729_s20 + $0x18] sm:$0xff]  ;;  %v284_v19 = vld [vmem:[%s1729_s20 + $0x20] sm:$0xff]  ;;  %v285_v22 = vld [vmem:[%s1729_s20 + $0x28] sm:$0xff]  ;;  %s1057_s13 = sshll.u32 %s1918_s8, 4  ;;  %s1962_s28 = scalar_lea.sflag [#allocation3], %s270_s17  ;;  %s1955_s13 = int_to_ptr.vmem [resolvable:$true] %s1057_s13 }
  0x1a   : > { %1238 = vmatmul.mubr.msk.f32.vlgmr.msra.gmra.mrb[0].mxu0 %vm305_vm0, %v281_v15  ;;  %1388 = vmatpush3.bf16.msra.mxu1 %v1385_v11  ;;  %v286_v24 = vld [vmem:[%s1729_s20 + $0x30] sm:$0xff]  ;;  %v287_v27 = vld [vmem:[%s1729_s20 + $0x38] sm:$0xff]  ;;  %v288_v29 = vld [vmem:[%s1729_s20 + $0x40] sm:$0xff]  ;;  %p1553_p0 = scmp.lt.s32.totalorder %s1955_s13, %s1551_s19 }
  0x1b   : > { %1240 = vmatprep.mubr.msk.f32.mxu0 %vm305_vm0, %v282_v16  ;;  %1390 = vmatprep.subr.bf16.mxu1 %v1389_v18  ;;  %v289_v32 = vld [vmem:[%s1729_s20 + $0x48] sm:$0xff]  ;;  %v290_v34 = vld [vmem:[%s1729_s20 + $0x50] sm:$0xff]  ;;  %v291_v35 = vld [vmem:[%s1729_s20 + $0x58] sm:$0xff] }
  0x1c   : > { %v292_v36 = vld [vmem:[%s1729_s20 + $0x60] sm:$0xff]  ;;  %v293_v37 = vld [vmem:[%s1729_s20 + $0x68] sm:$0xff]  ;;  %v294_v38 = vld [vmem:[%s1729_s20 + $0x70] sm:$0xff]  ;;  %1412 = vmatpush3.bf16.msra.mxu0 %v1409_v46 }
  0x1d   : > { %v295_v39 = vld [vmem:[%s1729_s20 + $0x78] sm:$0xff]  ;;  %1414 = vmatprep.subr.bf16.mxu0 %v1413_v48  ;;  %v1126_v0 = vld [vmem:[%s2005_s2] ss:$0 sm:$0xff]  ;;  %s1546_s20 = scalar_lea.vmem %s1955_s13, 2048 }
  0x1e   : > { %1241 = vmatmul.mubr.msk.f32.gmra.mrb[2].mxu0 %vm305_vm0, %v283_v17  ;;  %1392 = vmatpush3.bf16.msra.mxu1 %v1389_v18  ;;  %v714_v50 = vld [vmem:[%s2008_s5 + $0x78] sm:$0xff]  ;;  %v1143_v52 = vld [vmem:[%s2007_s4] ss:$0 sm:$0xff]  ;;  %p1547_p11 = scmp.ne.s32.totalorder %s1955_s13, %s1546_s20  ;;  %p1554_p1 = scmp.lt.s32.totalorder %s1552_s21, %s1546_s20 }
  0x1f   : > { %1243 = vmatprep.mubr.msk.f32.mxu0 %vm305_vm0, %v284_v19  ;;  %1394 = vmatprep.subr.bf16.mxu1 %v1393_v23 }
  0x20   : > { %1416 = vmatpush3.bf16.msra.mxu0 %v1413_v48  ;;  %p1548_p12 = pnand %p1547_p11, %p1691_p5  ;;  %p1555_p2 = por %p1554_p1, %p1553_p0 }
  0x21   : > { %1418 = vmatprep.subr.bf16.mxu0 %v1417_v51 }
  0x22   : > { %1244 = vmatmul.mubr.msk.f32.gmra.mrb[4].mxu0 %vm305_vm0, %v285_v22  ;;  %1396 = vmatpush3.bf16.msra.mxu1 %v1393_v23  ;;  %p1549_p13 = pneg %p1548_p12 }
  0x23   : > { %1246 = vmatprep.mubr.msk.f32.mxu0 %vm305_vm0, %v286_v24  ;;  %1398 = vmatprep.subr.bf16.mxu1 %v1397_v28 }
  0x24   : > { %1420 = vmatpush3.bf16.msra.mxu0 %v1417_v51  ;;  %v1437_v51 = vpack.c.bf16 %v714_v50, %v713_v49  ;;  %p1556_p3 = pnand %p1555_p2, %p1549_p13 }
  0x25   : > { %1422 = vmatprep.subr.bf16.mxu0 %v1421_v54 }
  0x26   : > { %1247 = vmatmul.mubr.msk.f32.gmra.mrb[6].mxu0 %vm305_vm0, %v287_v27  ;;  %1400 = vmatpush3.bf16.msra.mxu1 %v1397_v28 }
  0x27   : > { %1249 = vmatprep.mubr.msk.f32.mxu0 %vm305_vm0, %v288_v29  ;;  %1402 = vmatprep.subr.bf16.mxu1 %v1401_v33 }
  0x28   : > { %1424 = vmatpush3.bf16.msra.mxu0 %v1421_v54 }
  0x29   : > { %1426 = vmatprep.subr.bf16.mxu0 %v1425_v57 }
  0x2a   : > { %1250 = vmatmul.mubr.msk.f32.gmra.mrb[8].mxu0 %vm305_vm0, %v289_v32  ;;  %1404 = vmatpush3.bf16.msra.mxu1 %v1401_v33 }
  0x2b   : > { %1252 = vmatprep.mubr.msk.f32.mxu0 %vm305_vm0, %v290_v34  ;;  %1406 = vmatprep.subr.bf16.mxu1 %v1405_v42 }
  0x2c   : > { %1428 = vmatpush3.bf16.msra.mxu0 %v1425_v57 }
  0x2d   : > { %1430 = vmatprep.subr.bf16.mxu0 %v1429_v60 }
  0x2e   : > { %1253 = vmatmul.mubr.msk.f32.gmra.mrb[10].mxu0 %vm305_vm0, %v291_v35  ;;  %1408 = vmatpush3.bf16.msra.mxu1 %v1405_v42 }
  0x2f   : > { %1255 = vmatprep.mubr.msk.f32.mxu0 %vm305_vm0, %v292_v36 }
  0x30   : > { %1432 = vmatpush3.bf16.msra.mxu0 %v1429_v60 }
  0x31   : > { %1434 = vmatprep.subr.bf16.mxu0 %v1433_v63 }
  0x32   : > { %1256 = vmatmul.mubr.msk.f32.gmra.mrb[12].mxu0 %vm305_vm0, %v293_v37 }
  0x33   : > { %1258 = vmatprep.mubr.msk.f32.mxu0 %vm305_vm0, %v294_v38 }
  0x34   : > { %1436 = vmatpush3.bf16.msra.mxu0 %v1433_v63 }
  0x35   : > { %1438 = vmatprep.subr.bf16.mxu0 %v1437_v51 }
  0x36   : > { %1259 = vmatmul.mubr.msk.f32.gmra.mrb[14].mxu0 %vm305_vm0, %v295_v39 }
  0x38   : > { %1440 = vmatpush3.bf16.msra.mxu0 %v1437_v51 }
  0xed   : > { %v1239_v1 = vpop.f32.mrb[0].mxu0 }
  0xee   : > { %v426_v2 = vadd.f32 %v1239_v1, %v1126_v0  ;;  %v420_v3 = vpop.f32.mrb[1].mxu0 }
  0xef   : > { %v421_v4 = vadd.f32 %v1126_v0, %v420_v3 }
  0xf0   : > { %v500_v7 = vmax.f32 %v426_v2, 0.0 }
  0xf1   : > { %v1242_v5 = vpop.f32.mrb[2].mxu0  ;;  %v499_v6 = vmax.f32 %v421_v4, 0.0 }
  0xf2   : > { %v436_v8 = vadd.f32 %v1242_v5, %v1126_v0  ;;  %v430_v9 = vpop.f32.mrb[3].mxu0 }
  0xf3   : > { %v431_v10 = vadd.f32 %v1126_v0, %v430_v9  ;;  %1293 = vmatprep.mubr.f32.mxu1 %v499_v6 }
  0xf4   : > { %1294 = vmatmul.mubr.f32.vlgmr.msra.gmra.mrb[0].mxu1 %v500_v7  ;;  %v502_v13 = vmax.f32 %v436_v8, 0.0 }
  0xf5   : > { %v501_v11 = vmax.f32 %v431_v10, 0.0  ;;  %v1245_v12 = vpop.f32.mrb[4].mxu0 }
  0xf6   : > { %v446_v14 = vadd.f32 %v1245_v12, %v1126_v0  ;;  %v440_v15 = vpop.f32.mrb[5].mxu0 }
  0xf7   : > { %v441_v16 = vadd.f32 %v1126_v0, %v440_v15  ;;  %1296 = vmatprep.mubr.f32.mxu1 %v501_v11 }
  0xf8   : > { %v504_v17 = vmax.f32 %v446_v14, 0.0  ;;  %1297 = vmatmul.mubr.f32.gmra.mrb[2].mxu1 %v502_v13 }
  0xf9   : > { %v503_v18 = vmax.f32 %v441_v16, 0.0  ;;  %v1248_v19 = vpop.f32.mrb[6].mxu0 }
  0xfa   : > { %v456_v20 = vadd.f32 %v1248_v19, %v1126_v0  ;;  %v450_v21 = vpop.f32.mrb[7].mxu0 }
  0xfb   : > { %v451_v22 = vadd.f32 %v1126_v0, %v450_v21  ;;  %1299 = vmatprep.mubr.f32.mxu1 %v503_v18 }
  0xfc   : > { %v506_v23 = vmax.f32 %v456_v20, 0.0  ;;  %1300 = vmatmul.mubr.f32.gmra.mrb[4].mxu1 %v504_v17 }
  0xfd   : > { %v505_v24 = vmax.f32 %v451_v22, 0.0  ;;  %v1251_v25 = vpop.f32.mrb[8].mxu0 }
  0xfe   : > { %v466_v26 = vadd.f32 %v1251_v25, %v1126_v0  ;;  %v460_v27 = vpop.f32.mrb[9].mxu0 }
  0xff   : > { %v461_v28 = vadd.f32 %v1126_v0, %v460_v27  ;;  %1302 = vmatprep.mubr.f32.mxu1 %v505_v24 }
 0x100   : > { %v508_v29 = vmax.f32 %v466_v26, 0.0  ;;  %1303 = vmatmul.mubr.f32.gmra.mrb[6].mxu1 %v506_v23 }
 0x101   : > { %v507_v30 = vmax.f32 %v461_v28, 0.0  ;;  %v1254_v31 = vpop.f32.mrb[10].mxu0 }
 0x102   : > { %v476_v32 = vadd.f32 %v1254_v31, %v1126_v0  ;;  %v470_v33 = vpop.f32.mrb[11].mxu0 }
 0x103   : > { %v471_v34 = vadd.f32 %v1126_v0, %v470_v33  ;;  %1305 = vmatprep.mubr.f32.mxu1 %v507_v30 }
 0x104   : > { %v510_v35 = vmax.f32 %v476_v32, 0.0  ;;  %1306 = vmatmul.mubr.f32.gmra.mrb[8].mxu1 %v508_v29 }
 0x105   : > { %v509_v36 = vmax.f32 %v471_v34, 0.0  ;;  %v1257_v37 = vpop.f32.mrb[12].mxu0 }
 0x106   : > { %v486_v38 = vadd.f32 %v1257_v37, %v1126_v0  ;;  %v480_v39 = vpop.f32.mrb[13].mxu0  ;;  %v1144_v37 = vld [vmem:[%s2009_s6] ss:$0 sm:$0xff] }
 0x107   : > { %v481_v40 = vadd.f32 %v1126_v0, %v480_v39  ;;  %1308 = vmatprep.mubr.f32.mxu1 %v509_v36 }
 0x108   : > { %v512_v41 = vmax.f32 %v486_v38, 0.0  ;;  %1309 = vmatmul.mubr.f32.gmra.mrb[10].mxu1 %v510_v35 }
 0x109   : > { %v511_v42 = vmax.f32 %v481_v40, 0.0  ;;  %v1260_v43 = vpop.f32.mrb[14].mxu0 }
 0x10a   : > { %v496_v44 = vadd.f32 %v1260_v43, %v1126_v0  ;;  %v490_v45 = vpop.f32.mrb[15].mxu0 }
 0x10b   : > { %v491_v46 = vadd.f32 %v1126_v0, %v490_v45  ;;  %1311 = vmatprep.mubr.f32.mxu1 %v511_v42 }
 0x10c   : > { %v514_v47 = vmax.f32 %v496_v44, 0.0  ;;  %1312 = vmatmul.mubr.f32.gmra.mrb[12].mxu1 %v512_v41 }
 0x10d   : > { %v513_v48 = vmax.f32 %v491_v46, 0.0 }
 0x10f   : > { %1314 = vmatprep.mubr.f32.mxu1 %v513_v48 }
 0x110   : > { %1315 = vmatmul.mubr.f32.gmra.mrb[14].mxu1 %v514_v47 }
 0x1c7   : > { %v1295_v53 = vpop.f32.mrb[0].mxu1 }
 0x1c8   : > { %v610_v54 = vadd.f32 %v1295_v53, %v1143_v52  ;;  %v604_v55 = vpop.f32.mrb[1].mxu1 }
 0x1c9   : > { %v605_v56 = vadd.f32 %v1143_v52, %v604_v55 }
 0x1ca   : > { %v684_v59 = vmax.f32 %v610_v54, 0.0 }
 0x1cb   : > { %v683_v57 = vmax.f32 %v605_v56, 0.0  ;;  %v1298_v58 = vpop.f32.mrb[2].mxu1 }
 0x1cc   : > { %v620_v60 = vadd.f32 %v1298_v58, %v1143_v52  ;;  %v614_v61 = vpop.f32.mrb[3].mxu1 }
 0x1cd   : > { %v615_v62 = vadd.f32 %v1143_v52, %v614_v61  ;;  %1349 = vmatprep.mubr.f32.mxu0 %v683_v57 }
 0x1ce   : > { %1350 = vmatmul.mubr.f32.vlgmr.msra.gmra.mrb[16].mxu0 %v684_v59  ;;  %v686_v1 = vmax.f32 %v620_v60, 0.0 }
 0x1cf   : > { %v685_v63 = vmax.f32 %v615_v62, 0.0  ;;  %v1301_v0 = vpop.f32.mrb[4].mxu1 }
 0x1d0   : > { %v630_v2 = vadd.f32 %v1301_v0, %v1143_v52  ;;  %v624_v3 = vpop.f32.mrb[5].mxu1 }
 0x1d1   : > { %v625_v4 = vadd.f32 %v1143_v52, %v624_v3  ;;  %1352 = vmatprep.mubr.f32.mxu0 %v685_v63 }
 0x1d2   : > { %v688_v5 = vmax.f32 %v630_v2, 0.0  ;;  %1353 = vmatmul.mubr.f32.gmra.mrb[18].mxu0 %v686_v1 }
 0x1d3   : > { %v687_v6 = vmax.f32 %v625_v4, 0.0  ;;  %v1304_v7 = vpop.f32.mrb[6].mxu1 }
 0x1d4   : > { %v640_v8 = vadd.f32 %v1304_v7, %v1143_v52  ;;  %v634_v9 = vpop.f32.mrb[7].mxu1 }
 0x1d5   : > { %v635_v10 = vadd.f32 %v1143_v52, %v634_v9  ;;  %1355 = vmatprep.mubr.f32.mxu0 %v687_v6 }
 0x1d6   : > { %v690_v11 = vmax.f32 %v640_v8, 0.0  ;;  %1356 = vmatmul.mubr.f32.gmra.mrb[20].mxu0 %v688_v5 }
 0x1d7   : > { %v689_v12 = vmax.f32 %v635_v10, 0.0  ;;  %v1307_v13 = vpop.f32.mrb[8].mxu1 }
 0x1d8   : > { %v650_v14 = vadd.f32 %v1307_v13, %v1143_v52  ;;  %v644_v15 = vpop.f32.mrb[9].mxu1 }
 0x1d9   : > { %v645_v16 = vadd.f32 %v1143_v52, %v644_v15  ;;  %1358 = vmatprep.mubr.f32.mxu0 %v689_v12 }
 0x1da   : > { %v692_v17 = vmax.f32 %v650_v14, 0.0  ;;  %1359 = vmatmul.mubr.f32.gmra.mrb[22].mxu0 %v690_v11 }
 0x1db   : > { %v691_v18 = vmax.f32 %v645_v16, 0.0  ;;  %v1310_v19 = vpop.f32.mrb[10].mxu1 }
 0x1dc   : > { %v660_v20 = vadd.f32 %v1310_v19, %v1143_v52  ;;  %v654_v21 = vpop.f32.mrb[11].mxu1 }
 0x1dd   : > { %v655_v22 = vadd.f32 %v1143_v52, %v654_v21  ;;  %1361 = vmatprep.mubr.f32.mxu0 %v691_v18 }
 0x1de   : > { %v694_v23 = vmax.f32 %v660_v20, 0.0  ;;  %1362 = vmatmul.mubr.f32.gmra.mrb[24].mxu0 %v692_v17 }
 0x1df   : > { %v693_v24 = vmax.f32 %v655_v22, 0.0  ;;  %v1313_v25 = vpop.f32.mrb[12].mxu1 }
 0x1e0   : > { %v670_v26 = vadd.f32 %v1313_v25, %v1143_v52  ;;  %v664_v27 = vpop.f32.mrb[13].mxu1 }
 0x1e1   : > { %v665_v28 = vadd.f32 %v1143_v52, %v664_v27  ;;  %1364 = vmatprep.mubr.f32.mxu0 %v693_v24 }
 0x1e2   : > { %v696_v29 = vmax.f32 %v670_v26, 0.0  ;;  %1365 = vmatmul.mubr.f32.gmra.mrb[26].mxu0 %v694_v23 }
 0x1e3   : > { %v695_v30 = vmax.f32 %v665_v28, 0.0  ;;  %v1316_v31 = vpop.f32.mrb[14].mxu1 }
 0x1e4   : > { %v680_v32 = vadd.f32 %v1316_v31, %v1143_v52  ;;  %v674_v33 = vpop.f32.mrb[15].mxu1 }
 0x1e5   : > { %v675_v34 = vadd.f32 %v1143_v52, %v674_v33  ;;  %1367 = vmatprep.mubr.f32.mxu0 %v695_v30 }
 0x1e6   : > { %v698_v35 = vmax.f32 %v680_v32, 0.0  ;;  %1368 = vmatmul.mubr.f32.gmra.mrb[28].mxu0 %v696_v29 }
 0x1e7   : > { %v697_v36 = vmax.f32 %v675_v34, 0.0 }
 0x1e9   : > { %1370 = vmatprep.mubr.f32.mxu0 %v697_v36 }
 0x1ea   : > { %1371 = vmatmul.mubr.f32.gmra.mrb[30].mxu0 %v698_v35 }
 0x2a1   : > { %v1351_v38 = vpop.f32.mrb[16].mxu0 }
 0x2a2   : > { %v794_v39 = vadd.f32 %v1351_v38, %v1144_v37  ;;  %v788_v40 = vpop.f32.mrb[17].mxu0 }
 0x2a3   : > { %v789_v42 = vadd.f32 %v1144_v37, %v788_v40 }
 0x2a4   : > { %869 = vmax.xlane.f32.xlu0 %v794_v39 }
 0x2a5   : > { %v1354_v41 = vpop.f32.mrb[18].mxu0 }
 0x2a6   : > { %v804_v43 = vadd.f32 %v1354_v41, %v1144_v37  ;;  %v798_v44 = vpop.f32.mrb[19].mxu0 }
 0x2a7   : > { %v799_v46 = vadd.f32 %v1144_v37, %v798_v44 }
 0x2a8   : > { %873 = vmax.xlane.f32.xlu1 %v804_v43  ;;  %867 = vmax.xlane.f32.xlu0 %v789_v42 }
 0x2a9   : > { %v1357_v45 = vpop.f32.mrb[20].mxu0 }
 0x2aa   : > { %v808_v47 = vpop.f32.mrb[21].mxu0  ;;  %v814_v50 = vadd.f32 %v1357_v45, %v1144_v37 }
 0x2ab   : > { %v809_v48 = vadd.f32 %v1144_v37, %v808_v47 }
 0x2ac   : > { %871 = vmax.xlane.f32.xlu1 %v799_v46 }
 0x2ad   : > { %v1360_v49 = vpop.f32.mrb[22].mxu0  ;;  %875 = vmax.xlane.f32.xlu0 %v809_v48 }
 0x2ae   : > { %v818_v51 = vpop.f32.mrb[23].mxu0  ;;  %v824_v54 = vadd.f32 %v1360_v49, %v1144_v37 }
 0x2af   : > { %v819_v52 = vadd.f32 %v1144_v37, %v818_v51 }
 0x2b0   : > { %877 = vmax.xlane.f32.xlu1 %v814_v50 }
 0x2b1   : > { %v1363_v53 = vpop.f32.mrb[24].mxu0  ;;  %879 = vmax.xlane.f32.xlu0 %v819_v52 }
 0x2b2   : > { %v828_v55 = vpop.f32.mrb[25].mxu0  ;;  %v834_v58 = vadd.f32 %v1363_v53, %v1144_v37 }
 0x2b3   : > { %v829_v56 = vadd.f32 %v1144_v37, %v828_v55 }
 0x2b4   : > { %881 = vmax.xlane.f32.xlu1 %v824_v54 }
 0x2b5   : > { %v1366_v57 = vpop.f32.mrb[26].mxu0  ;;  %883 = vmax.xlane.f32.xlu0 %v829_v56 }
 0x2b6   : > { %v838_v59 = vpop.f32.mrb[27].mxu0  ;;  %v844_v62 = vadd.f32 %v1366_v57, %v1144_v37 }
 0x2b7   : > { %v839_v60 = vadd.f32 %v1144_v37, %v838_v59 }
 0x2b8   : > { %885 = vmax.xlane.f32.xlu1 %v834_v58 }
 0x2b9   : > { %v1369_v61 = vpop.f32.mrb[28].mxu0  ;;  %887 = vmax.xlane.f32.xlu0 %v839_v60 }
 0x2ba   : > { %v848_v63 = vpop.f32.mrb[29].mxu0  ;;  %v1853_v2 = vadd.f32 %v1369_v61, %v1144_v37 }
 0x2bb   : > { %v1850_v0 = vadd.f32 %v1144_v37, %v848_v63 }
 0x2bc   : > { %889 = vmax.xlane.f32.xlu1 %v844_v62 }
 0x2bd   : > { %v1372_v1 = vpop.f32.mrb[30].mxu0  ;;  %891 = vmax.xlane.f32.xlu0 %v1850_v0 }
 0x2be   : > { %v858_v3 = vpop.f32.mrb[31].mxu0  ;;  %v1859_v5 = vadd.f32 %v1372_v1, %v1144_v37 }
 0x2bf   : > { %v1855_v4 = vadd.f32 %v1144_v37, %v858_v3 }
 0x2c0   : > { %893 = vmax.xlane.f32.xlu1 %v1853_v2 }
 0x2c1   : > { %895 = vmax.xlane.f32.xlu0 %v1855_v4 }
 0x2c4   : > { %897 = vmax.xlane.f32.xlu1 %v1859_v5 }
 0x331   : > { %v870_v6 = vpop.xlane.xlu0 %869 }
 0x332   : > { %v1862_v7 = vsub.f32 %v794_v39, %v870_v6 }
 0x334   : > { %v917_v8 = vmul.f32 1.442695, %v1862_v7 }
 0x335   : > { %v874_v9 = vpop.xlane.xlu1 %873  ;;  %v868_v10 = vpop.xlane.xlu0 %867 }
 0x336   : > { %1482 = vpow2.f32 %v917_v8  ;;  %v1865_v11 = vsub.f32 %v804_v43, %v874_v9  ;;  %v1867_v12 = vsub.f32 %v789_v42, %v868_v10 }
 0x338   : > { %v921_v13 = vmul.f32 1.442695, %v1865_v11  ;;  %v915_v14 = vmul.f32 1.442695, %v1867_v12 }
 0x339   : > { %v872_v15 = vpop.xlane.xlu1 %871 }
 0x33a   : > { %1484 = vpow2.f32 %v921_v13  ;;  %v1871_v16 = vsub.f32 %v799_v46, %v872_v15  ;;  %v876_v17 = vpop.xlane.xlu0 %875 }
 0x33b   : > { %1486 = vpow2.f32 %v915_v14  ;;  %v1873_v18 = vsub.f32 %v809_v48, %v876_v17 }
 0x33c   : > { %v919_v19 = vmul.f32 1.442695, %v1871_v16 }
 0x33d   : > { %v878_v20 = vpop.xlane.xlu1 %877  ;;  %v923_v23 = vmul.f32 1.442695, %v1873_v18 }
 0x33e   : > { %1488 = vpow2.f32 %v919_v19  ;;  %v1876_v21 = vsub.f32 %v814_v50, %v878_v20  ;;  %v880_v22 = vpop.xlane.xlu0 %879 }
 0x33f   : > { %v1879_v24 = vsub.f32 %v819_v52, %v880_v22 }
 0x340   : > { %v1483_v25 = vpop.eup %1482  ;;  %v925_v26 = vmul.f32 1.442695, %v1876_v21 }
 0x341   : > { %949 = vadd.xlane.f32.xlu1 %v1483_v25  ;;  %v882_v27 = vpop.xlane.xlu1 %881  ;;  %v927_v30 = vmul.f32 1.442695, %v1879_v24 }
 0x342   : > { %1490 = vpow2.f32 %v925_v26  ;;  %v1882_v28 = vsub.f32 %v824_v54, %v882_v27  ;;  %v884_v29 = vpop.xlane.xlu0 %883 }
 0x343   : > { %1492 = vpow2.f32 %v923_v23  ;;  %v1885_v31 = vsub.f32 %v829_v56, %v884_v29 }
 0x344   : > { %v1485_v32 = vpop.eup %1484  ;;  %v929_v33 = vmul.f32 1.442695, %v1882_v28 }
 0x345   : > { %v1487_v34 = vpop.eup %1486  ;;  %953 = vadd.xlane.f32.xlu1 %v1485_v32  ;;  %v886_v35 = vpop.xlane.xlu1 %885  ;;  %v931_v38 = vmul.f32 1.442695, %v1885_v31 }
 0x346   : > { %1494 = vpow2.f32 %v929_v33  ;;  %v1888_v36 = vsub.f32 %v834_v58, %v886_v35  ;;  %947 = vadd.xlane.f32.xlu0 %v1487_v34  ;;  %v888_v37 = vpop.xlane.xlu0 %887 }
 0x347   : > { %1496 = vpow2.f32 %v927_v30  ;;  %v1891_v39 = vsub.f32 %v839_v60, %v888_v37 }
 0x348   : > { %v1489_v40 = vpop.eup %1488  ;;  %v933_v41 = vmul.f32 1.442695, %v1888_v36 }
 0x349   : > { %v890_v42 = vpop.xlane.xlu1 %889  ;;  %v935_v45 = vmul.f32 1.442695, %v1891_v39 }
 0x34a   : > { %1498 = vpow2.f32 %v933_v41  ;;  %v1894_v43 = vsub.f32 %v844_v62, %v890_v42  ;;  %951 = vadd.xlane.f32.xlu0 %v1489_v40  ;;  %v892_v44 = vpop.xlane.xlu0 %891 }
 0x34b   : > { %1500 = vpow2.f32 %v931_v38  ;;  %v1898_v46 = vsub.f32 %v1850_v0, %v892_v44 }
 0x34c   : > { %v1491_v47 = vpop.eup %1490  ;;  %v937_v48 = vmul.f32 1.442695, %v1894_v43 }
 0x34d   : > { %v1493_v49 = vpop.eup %1492  ;;  %957 = vadd.xlane.f32.xlu1 %v1491_v47  ;;  %v894_v50 = vpop.xlane.xlu1 %893  ;;  %v939_v53 = vmul.f32 1.442695, %v1898_v46 }
 0x34e   : > { %1502 = vpow2.f32 %v937_v48  ;;  %v1902_v51 = vsub.f32 %v1853_v2, %v894_v50  ;;  %955 = vadd.xlane.f32.xlu0 %v1493_v49  ;;  %v896_v52 = vpop.xlane.xlu0 %895 }
 0x34f   : > { %1504 = vpow2.f32 %v935_v45  ;;  %v1906_v54 = vsub.f32 %v1855_v4, %v896_v52 }
 0x350   : > { %v1495_v55 = vpop.eup %1494  ;;  %v941_v56 = vmul.f32 1.442695, %v1902_v51 }
 0x351   : > { %v1497_v57 = vpop.eup %1496  ;;  %961 = vadd.xlane.f32.xlu1 %v1495_v55  ;;  %v898_v58 = vpop.xlane.xlu1 %897  ;;  %v943_v60 = vmul.f32 1.442695, %v1906_v54 }
 0x352   : > { %1506 = vpow2.f32 %v941_v56  ;;  %v1910_v59 = vsub.f32 %v1859_v5, %v898_v58  ;;  %959 = vadd.xlane.f32.xlu0 %v1497_v57 }
 0x353   : > { %1508 = vpow2.f32 %v939_v53 }
 0x354   : > { %v1499_v61 = vpop.eup %1498  ;;  %v945_v62 = vmul.f32 1.442695, %v1910_v59 }
 0x355   : > { %v1501_v63 = vpop.eup %1500  ;;  %965 = vadd.xlane.f32.xlu1 %v1499_v61 }
 0x356   : > { %1510 = vpow2.f32 %v945_v62  ;;  %963 = vadd.xlane.f32.xlu0 %v1501_v63 }
 0x357   : > { %1512 = vpow2.f32 %v943_v60 }
 0x358   : > { %v1503_v0 = vpop.eup %1502 }
 0x359   : > { %v1505_v1 = vpop.eup %1504  ;;  %969 = vadd.xlane.f32.xlu1 %v1503_v0 }
 0x35a   : > { %967 = vadd.xlane.f32.xlu0 %v1505_v1 }
 0x35c   : > { %v1507_v2 = vpop.eup %1506 }
 0x35d   : > { %v1509_v3 = vpop.eup %1508  ;;  %973 = vadd.xlane.f32.xlu1 %v1507_v2 }
 0x35e   : > { %971 = vadd.xlane.f32.xlu0 %v1509_v3 }
 0x360   : > { %v1511_v4 = vpop.eup %1510 }
 0x361   : > { %v1513_v5 = vpop.eup %1512  ;;  %977 = vadd.xlane.f32.xlu1 %v1511_v4 }
 0x362   : > { %975 = vadd.xlane.f32.xlu0 %v1513_v5 }
 0x3ce   : > { %v950_v6 = vpop.xlane.xlu1 %949 }
 0x3cf   : > { %1514 = vlog2.f32 %v950_v6 }
 0x3d2   : > { %v954_v8 = vpop.xlane.xlu1 %953 }
 0x3d3   : > { %1516 = vlog2.f32 %v954_v8  ;;  %v948_v9 = vpop.xlane.xlu0 %947 }
 0x3d4   : > { %1518 = vlog2.f32 %v948_v9 }
 0x3d7   : > { %v952_v10 = vpop.xlane.xlu0 %951 }
 0x3d8   : > { %1520 = vlog2.f32 %v952_v10 }
 0x3d9   : > { %v1515_v13 = vpop.eup %1514 }
 0x3da   : > { %v982_v14 = vmul.f32 0.6931472, %v1515_v13  ;;  %v958_v15 = vpop.xlane.xlu1 %957 }
 0x3db   : > { %1522 = vlog2.f32 %v958_v15  ;;  %v956_v17 = vpop.xlane.xlu0 %955 }
 0x3dc   : > { %v1012_v19 = vsub.f32 %v1862_v7, %v982_v14  ;;  %1524 = vlog2.f32 %v956_v17 }
 0x3dd   : > { %v1517_v20 = vpop.eup %1516 }
 0x3de   : > { %v1519_v22 = vpop.eup %1518  ;;  %1028 = vst [vmem:[%s1918_s8 + $0x8] sm:$0xff] %v1012_v19  ;;  %v986_v23 = vmul.f32 0.6931472, %v1517_v20  ;;  %v962_v25 = vpop.xlane.xlu1 %961 }
 0x3df   : > { %v980_v26 = vmul.f32 0.6931472, %v1519_v22  ;;  %1526 = vlog2.f32 %v962_v25  ;;  %v960_v27 = vpop.xlane.xlu0 %959 }
 0x3e0   : > { %v1014_v29 = vsub.f32 %v1865_v11, %v986_v23  ;;  %1528 = vlog2.f32 %v960_v27 }
 0x3e1   : > { %v1011_v7 = vsub.f32 %v1867_v12, %v980_v26 }
 0x3e2   : > { %v1521_v30 = vpop.eup %1520  ;;  %1030 = vst [vmem:[%s1918_s8 + $0x18] sm:$0xff] %v1014_v29  ;;  %v966_v32 = vpop.xlane.xlu1 %965 }
 0x3e3   : > { %1027 = vst [vmem:[%s1918_s8] sm:$0xff] %v1011_v7  ;;  %v984_v33 = vmul.f32 0.6931472, %v1521_v30  ;;  %1530 = vlog2.f32 %v966_v32  ;;  %v964_v34 = vpop.xlane.xlu0 %963 }
 0x3e4   : > { %1532 = vlog2.f32 %v964_v34 }
 0x3e5   : > { %v1523_v35 = vpop.eup %1522  ;;  %v1013_v37 = vsub.f32 %v1871_v16, %v984_v33 }
 0x3e6   : > { %v1525_v38 = vpop.eup %1524  ;;  %v990_v40 = vmul.f32 0.6931472, %v1523_v35  ;;  %v970_v11 = vpop.xlane.xlu1 %969 }
 0x3e7   : > { %1029 = vst [vmem:[%s1918_s8 + $0x10] sm:$0xff] %v1013_v37  ;;  %v988_v41 = vmul.f32 0.6931472, %v1525_v38  ;;  %1534 = vlog2.f32 %v970_v11  ;;  %v968_v12 = vpop.xlane.xlu0 %967 }
 0x3e8   : > { %v1016_v42 = vsub.f32 %v1876_v21, %v990_v40  ;;  %1536 = vlog2.f32 %v968_v12 }
 0x3e9   : > { %v1527_v44 = vpop.eup %1526  ;;  %v1015_v45 = vsub.f32 %v1873_v18, %v988_v41 }
 0x3ea   : > { %v1529_v47 = vpop.eup %1528  ;;  %1032 = vst [vmem:[%s1918_s8 + $0x28] sm:$0xff] %v1016_v42  ;;  %v994_v48 = vmul.f32 0.6931472, %v1527_v44  ;;  %v974_v16 = vpop.xlane.xlu1 %973 }
 0x3eb   : > { %1031 = vst [vmem:[%s1918_s8 + $0x20] sm:$0xff] %v1015_v45  ;;  %v992_v49 = vmul.f32 0.6931472, %v1529_v47  ;;  %1538 = vlog2.f32 %v974_v16  ;;  %v972_v50 = vpop.xlane.xlu0 %971 }
 0x3ec   : > { %v1018_v52 = vsub.f32 %v1882_v28, %v994_v48  ;;  %1540 = vlog2.f32 %v972_v50 }
 0x3ed   : > { %v1531_v53 = vpop.eup %1530  ;;  %v1017_v21 = vsub.f32 %v1879_v24, %v992_v49 }
 0x3ee   : > { %v1533_v55 = vpop.eup %1532  ;;  %1034 = vst [vmem:[%s1918_s8 + $0x38] sm:$0xff] %v1018_v52  ;;  %v998_v18 = vmul.f32 0.6931472, %v1531_v53  ;;  %v978_v56 = vpop.xlane.xlu1 %977 }
 0x3ef   : > { %1033 = vst [vmem:[%s1918_s8 + $0x30] sm:$0xff] %v1017_v21  ;;  %v996_v57 = vmul.f32 0.6931472, %v1533_v55  ;;  %1542 = vlog2.f32 %v978_v56  ;;  %v976_v58 = vpop.xlane.xlu0 %975 }
 0x3f0   : > { %v1020_v60 = vsub.f32 %v1888_v36, %v998_v18  ;;  %1544 = vlog2.f32 %v976_v58 }
 0x3f1   : > { %v1535_v28 = vpop.eup %1534  ;;  %v1019_v61 = vsub.f32 %v1885_v31, %v996_v57 }
 0x3f2   : > { %v1537_v62 = vpop.eup %1536  ;;  %1036 = vst [vmem:[%s1918_s8 + $0x48] sm:$0xff] %v1020_v60  ;;  %v1002_v24 = vmul.f32 0.6931472, %v1535_v28 }
 0x3f3   : > { %1035 = vst [vmem:[%s1918_s8 + $0x40] sm:$0xff] %v1019_v61  ;;  %v1000_v63 = vmul.f32 0.6931472, %v1537_v62 }
 0x3f4   : > { %v1022_v0 = vsub.f32 %v1894_v43, %v1002_v24 }
 0x3f5   : > { %v1539_v1 = vpop.eup %1538  ;;  %v1021_v2 = vsub.f32 %v1891_v39, %v1000_v63 }
 0x3f6   : > { %v1541_v3 = vpop.eup %1540  ;;  %1038 = vst [vmem:[%s1918_s8 + $0x58] sm:$0xff] %v1022_v0  ;;  %v1006_v36 = vmul.f32 0.6931472, %v1539_v1 }
 0x3f7   : > { %1037 = vst [vmem:[%s1918_s8 + $0x50] sm:$0xff] %v1021_v2  ;;  %v1004_v31 = vmul.f32 0.6931472, %v1541_v3 }
 0x3f8   : > { %v1024_v4 = vsub.f32 %v1902_v51, %v1006_v36 }
 0x3f9   : > { %v1543_v5 = vpop.eup %1542  ;;  %v1023_v6 = vsub.f32 %v1898_v46, %v1004_v31 }
 0x3fa   : > { %v1545_v43 = vpop.eup %1544  ;;  %1040 = vst [vmem:[%s1918_s8 + $0x68] sm:$0xff] %v1024_v4  ;;  %v1010_v8 = vmul.f32 0.6931472, %v1543_v5 }
 0x3fb   : > { %1039 = vst [vmem:[%s1918_s8 + $0x60] sm:$0xff] %v1023_v6  ;;  %v1008_v39 = vmul.f32 0.6931472, %v1545_v43 }
 0x3fc   : > { %v1026_v9 = vsub.f32 %v1910_v59, %v1010_v8 }
 0x3fd   : > { %v1025_v46 = vsub.f32 %v1906_v54, %v1008_v39 }
 0x3fe   : > { %1042 = vst [vmem:[%s1918_s8 + $0x78] sm:$0xff] %v1026_v9 }
 0x3ff   : > { %1041 = vst [vmem:[%s1918_s8 + $0x70] sm:$0xff] %v1025_v46 }
 0x400   : > { %1559 = shalt.err (!%p1556_p3)
}
 0x401   : > { %s1560_s22 = scalar_lea.hbm %s1953_s16, 2048  ;;  %s1564_s29 = scalar_lea.hbm %s2010_s7, 4096 }
 0x402   : > { %p1561_p4 = scmp.ne.s32.totalorder %s1953_s16, %s1560_s22  ;;  %p1565_p9 = scmp.lt.u32.totalorder %s1953_s16, %s2010_s7 }
 0x403   : > { %p1566_p10 = scmp.lt.u32.totalorder %s1564_s29, %s1560_s22  ;;  %p1568_p12 = scmp.lt.u32.totalorder %s1560_s22, %s1953_s16 }
 0x404   : > { %p1562_p7 = pnand %p1561_p4, %p1691_p5 }
 0x405   : > { %p1567_p11 = por %p1566_p10, %p1565_p9 }
 0x406   : > { %p1563_p8 = pneg %p1562_p7 }
 0x407   : > { %p1569_p13 = por %p1568_p12, %p1567_p11 }
 0x409   : > { %p1570_p0 = pnand %p1569_p13, %p1563_p8 }
 0x40b   : > { %1573 = shalt.err (!%p1570_p0)
}
 0x40c   : > { %s1611_s14 = smov 128   ;;  %s1612_s15 = smov 8  }
 0x40d   : > { %1441 = dma.vmem_to_hbm [thread:$0]  (%p1691_p5), %s1955_s13, 2048, %s1953_s16, %s1962_s28, %s1611_s14, %s1611_s14, %s1612_s15  }
 0x40e PF: > { %p1447_p1 = scmp.ge.s32.totalorder %s1608_s27, 2  ;;  %s1072_s20 = sand.u32 1, %s1596_s24  }
 0x40f   : > { %s1073_s18 = scalar_lea.sflag [#allocation3], %s1072_s20 }
 0x410   : > { %p1444_p2 = pnand %p1447_p1, %p1695_p6 }
 0x412   : > { %1591 = dma.done.wait (!%p1444_p2), %s1073_s18, 2048  }
 0x413   : > { %1593 = vsyncadd (!%p1444_p2), %s1073_s18, 4294965248  ;;  %p17_p3 = scmp.ge.s32.totalorder %s1678_s30, 4   ;;  %s2013_s24 = smov %s1600_s25 }
 0x414   : > { %s2014_s25 = smov %s1604_s26  ;;  %s2015_s26 = smov %s1689_s10 }
 0x415   : > { %s2016_s27 = smov %s1678_s30  ;;  %19 = sbr.rel (!%p17_p3) target bundleno = 3 (0x3), region = 83 }
 0x41c   :  { %1078 = vsyncpa [#allocation3], 1 }
 0x41d   :  { %1080 = vsyncpa [#allocation3 + $0x1], 1 }

// kernel: tpu_custom_call.1
= control target key start
LH: loop header
LB: loop body
LE: loop exit
PB: predicated region body
PF: predicated region fallthrough
CT: control target
= control target key end

     0   :  { %12 = vsyncpa [#allocation3], 0  ;;  %s2003_s0 = inlined_call_operand.vmem [shape: f32[256,16], index: 0, kind: input, shape index: {}]   ;;  %s2004_s1 = inlined_call_operand.vmem [shape: f32[16,128], index: 1, kind: input, shape index: {}]   ;;  %s2005_s2 = inlined_call_operand.vmem [shape: f32[1,128], index: 2, kind: input, shape index: {}]   ;;  %s2006_s3 = inlined_call_operand.vmem [shape: f32[128,128], index: 3, kind: input, shape index: {}]   ;;  %s2007_s4 = inlined_call_operand.vmem [shape: f32[1,128], index: 4, kind: input, shape index: {}]   ;;  %s2008_s5 = inlined_call_operand.vmem [shape: f32[128,128], index: 5, kind: input, shape index: {}]   ;;  %s2009_s6 = inlined_call_operand.vmem [shape: f32[1,128], index: 6, kind: input, shape index: {}]   ;;  %s2010_s7 = inlined_call_operand.hbm [shape: f32[256,128], index: 7, kind: output, shape index: {}]  }
   0x1   :  { %14 = vsyncpa [#allocation3 + $0x1], 0  ;;  %s1653_s24 = smov 0   ;;  %s1655_s25 = smov 0  }
   0x2   :  { %s1657_s26 = smov 0   ;;  %s1659_s27 = smov 0  }
   0x3 LB: > { %s1674_s28 = sadd.s32 4294967295, %s1608_s27   ;;  %s1119_s29 = sadd.s32 4294967294, %s1608_s27   ;;  %s1608_s27 = sphi %s1659_s27, %s2016_s27   ;;  %s1604_s26 = sphi %s1657_s26, %s2015_s26   ;;  %s1600_s25 = sphi %s1655_s25, %s2014_s25   ;;  %s1596_s24 = sphi %s1653_s24, %s2013_s24  }
   0x4   : > { %s1678_s30 = sadd.s32 1, %s1608_s27   ;;  %s179_s8 = sadd.s32 1, %s1604_s26 }
   0x5   : > { %s176_s9 = ssub.s32 %s1608_s27, %s1678_s30  ;;  %p189_p0 = scmp.ne.s32.totalorder %s1604_s26, %s1600_s25 }
   0x6   : > { %p177_p1 = scmp.eq.s32.totalorder %s176_s9, 0  ;;  %p190_p2 = scmp.eq.s32.totalorder %s1674_s28, 1 }
   0x7   : > { %p195_p3 = scmp.ne.s32.totalorder %s1600_s25, %s1596_s24  ;;  %p196_p4 = scmp.eq.s32.totalorder %s1119_s29, 1 }
   0x8   : > { %s1689_s10 = scalar_select %p177_p1, %s1604_s26, %s179_s8  }
   0x9   : > { %p1691_p5 = por %p190_p2, %p189_p0  ;;  %p1695_p6 = por %p196_p4, %p195_p3 }
   0xa   : > { %p1122_p7 = scmp.ge.s32.totalorder %s1608_s27, 1  ;;  %p241_p8 = scmp.lt.s32.totalorder %s1608_s27, 3 }
   0xc   : > { %p242_p9 = pnand %p1122_p7, %p241_p8 }
   0xd   : > { %v296_v0 = vld [vmem:[%s2004_s1] sm:$0xff] (!%p242_p9)  ;;  %v297_v1 = vld [vmem:[%s2004_s1 + $0x8] sm:$0xff] (!%p242_p9)  ;;  %s1124_s17 = sshll.u32 (!%p242_p9), %s1674_s28, 4  ;;  %v517_v5 = vld [vmem:[%s2006_s3 + $0x10] sm:$0xff] (!%p242_p9)  ;;  %vm305_vm0 = vcmask (!%p242_p9), 130048   ;;  %s1150_s9 = sshll.u32 (!%p242_p9), %s1674_s28, 11 }
   0xe   : > { %245 = sbr.rel (%p242_p9) target bundleno = 1038 (0x40e), region = 48  ;;  %v515_v2 = vld [vmem:[%s2006_s3] sm:$0xff] (!%p242_p9)  ;;  %v1373_v3 = vpack.c.bf16 (!%p242_p9), %v297_v1, %v296_v0  ;;  %p274_p10 = scmp.lt.s32.totalorder (!%p242_p9), %s1124_s17, 31  ;;  %v516_v4 = vld [vmem:[%s2006_s3 + $0x8] sm:$0xff] (!%p242_p9)  ;;  %v518_v6 = vld [vmem:[%s2006_s3 + $0x18] sm:$0xff] (!%p242_p9) }
   0xf   : > { %v1377_v7 = vpack.c.bf16 (!%p242_p9), %v516_v4, %v515_v2  ;;  %v1381_v8 = vpack.c.bf16 (!%p242_p9), %v518_v6, %v517_v5  ;;  %v519_v9 = vld [vmem:[%s2006_s3 + $0x20] sm:$0xff] (!%p242_p9)  ;;  %v520_v10 = vld [vmem:[%s2006_s3 + $0x28] sm:$0xff] (!%p242_p9)  ;;  %v521_v12 = vld [vmem:[%s2006_s3 + $0x30] sm:$0xff] (!%p242_p9)  ;;  %s1610_s18 = smov (!%p242_p9), [#allocation2]  }
  0x10   : > { %1374 = vmatprep.subr.bf16.mxu0 (!%p242_p9), %v1373_v3  ;;  %v1385_v11 = vpack.c.bf16 (!%p242_p9), %v520_v10, %v519_v9  ;;  %v522_v13 = vld [vmem:[%s2006_s3 + $0x38] sm:$0xff] (!%p242_p9)  ;;  %v523_v20 = vld [vmem:[%s2006_s3 + $0x40] sm:$0xff] (!%p242_p9)  ;;  %v524_v21 = vld [vmem:[%s2006_s3 + $0x48] sm:$0xff] (!%p242_p9)  ;;  %s1550_s19 = sshll.u32 (!%p242_p9), %s1610_s18, 4  ;;  %s1551_s19 = int_to_ptr.vmem [resolvable:$false] %s1550_s19 }
  0x11   : > { %1376 = vmatpush3.bf16.msra.mxu0 (!%p242_p9), %v1373_v3  ;;  %1378 = vmatprep.subr.bf16.mxu1 (!%p242_p9), %v1377_v7  ;;  %v1389_v18 = vpack.c.bf16 (!%p242_p9), %v522_v13, %v521_v12  ;;  %v1393_v23 = vpack.c.bf16 (!%p242_p9), %v524_v21, %v523_v20  ;;  %v525_v25 = vld [vmem:[%s2006_s3 + $0x50] sm:$0xff] (!%p242_p9)  ;;  %v526_v26 = vld [vmem:[%s2006_s3 + $0x58] sm:$0xff] (!%p242_p9)  ;;  %v527_v30 = vld [vmem:[%s2006_s3 + $0x60] sm:$0xff] (!%p242_p9)  ;;  %s1552_s21 = scalar_lea.vmem (!%p242_p9), %s1551_s19, 4096 }
  0x12   : > { %1380 = vmatpush3.bf16.msra.mxu1 (!%p242_p9), %v1377_v7  ;;  %v1397_v28 = vpack.c.bf16 (!%p242_p9), %v526_v26, %v525_v25  ;;  %v528_v31 = vld [vmem:[%s2006_s3 + $0x68] sm:$0xff] (!%p242_p9)  ;;  %v529_v40 = vld [vmem:[%s2006_s3 + $0x70] sm:$0xff] (!%p242_p9)  ;;  %v530_v41 = vld [vmem:[%s2006_s3 + $0x78] sm:$0xff] (!%p242_p9) }
  0x13   : > { %1382 = vmatprep.subr.bf16.mxu1 (!%p242_p9), %v1381_v8  ;;  %v1401_v33 = vpack.c.bf16 (!%p242_p9), %v528_v31, %v527_v30  ;;  %v1405_v42 = vpack.c.bf16 (!%p242_p9), %v530_v41, %v529_v40  ;;  %v699_v43 = vld [vmem:[%s2008_s5] sm:$0xff] (!%p242_p9)  ;;  %v700_v44 = vld [vmem:[%s2008_s5 + $0x8] sm:$0xff] (!%p242_p9)  ;;  %v701_v45 = vld [vmem:[%s2008_s5 + $0x10] sm:$0xff] (!%p242_p9) }
  0x14   : > { %v1409_v46 = vpack.c.bf16 (!%p242_p9), %v700_v44, %v699_v43  ;;  %v702_v47 = vld [vmem:[%s2008_s5 + $0x18] sm:$0xff] (!%p242_p9)  ;;  %v703_v49 = vld [vmem:[%s2008_s5 + $0x20] sm:$0xff] (!%p242_p9)  ;;  %v704_v50 = vld [vmem:[%s2008_s5 + $0x28] sm:$0xff] (!%p242_p9) }
  0x15   : > { %s2018_s17 = smov (!%p274_p10, %s1124_s17), 31  ;;  %v1413_v48 = vpack.c.bf16 %v702_v47, %v701_v45  ;;  %v1417_v51 = vpack.c.bf16 %v704_v50, %v703_v49  ;;  %v705_v52 = vld [vmem:[%s2008_s5 + $0x30] sm:$0xff]  ;;  %v706_v53 = vld [vmem:[%s2008_s5 + $0x38] sm:$0xff]  ;;  %v707_v55 = vld [vmem:[%s2008_s5 + $0x40] sm:$0xff] }
  0x16   : > { %s1125_s16 = sshll.u32 %s2018_s17, 3  ;;  %1384 = vmatpush3.bf16.msra.mxu1 %v1381_v8  ;;  %1410 = vmatprep.subr.bf16.mxu0 %v1409_v46  ;;  %v1421_v54 = vpack.c.bf16 %v706_v53, %v705_v52  ;;  %v708_v56 = vld [vmem:[%s2008_s5 + $0x48] sm:$0xff]  ;;  %v709_v58 = vld [vmem:[%s2008_s5 + $0x50] sm:$0xff]  ;;  %v710_v59 = vld [vmem:[%s2008_s5 + $0x58] sm:$0xff]  ;;  %s270_s17 = sand.u32 1, %s1600_s25  }
  0x17   : > { %s1729_s20 = scalar_lea.vmem %s2003_s0, %s1125_s16  ;;  %1386 = vmatprep.subr.bf16.mxu1 %v1385_v11  ;;  %v1425_v57 = vpack.c.bf16 %v708_v56, %v707_v55  ;;  %v1429_v60 = vpack.c.bf16 %v710_v59, %v709_v58  ;;  %v711_v61 = vld [vmem:[%s2008_s5 + $0x60] sm:$0xff]  ;;  %v712_v62 = vld [vmem:[%s2008_s5 + $0x68] sm:$0xff]  ;;  %v713_v49 = vld [vmem:[%s2008_s5 + $0x70] sm:$0xff]  ;;  %s1123_s29 = sshll.u32 %s270_s17, 7 }
  0x18   : > { %v280_v14 = vld [vmem:[%s1729_s20] sm:$0xff]  ;;  %v281_v15 = vld [vmem:[%s1729_s20 + $0x8] sm:$0xff]  ;;  %v282_v16 = vld [vmem:[%s1729_s20 + $0x10] sm:$0xff]  ;;  %v1433_v63 = vpack.c.bf16 %v712_v62, %v711_v61  ;;  %s1918_s8 = scalar_lea.vmem [#allocation2], %s1123_s29  ;;  %s1953_s16 = scalar_lea.hbm %s2010_s7, %s1150_s9 }
  0x19   : > { %1237 = vmatprep.mubr.msk.f32.mxu0 %vm305_vm0, %v280_v14  ;;  %v283_v17 = vld [vmem:[%s1729_s20 + $0x18] sm:$0xff]  ;;  %v284_v19 = vld [vmem:[%s1729_s20 + $0x20] sm:$0xff]  ;;  %v285_v22 = vld [vmem:[%s1729_s20 + $0x28] sm:$0xff]  ;;  %s1057_s13 = sshll.u32 %s1918_s8, 4  ;;  %s1962_s28 = scalar_lea.sflag [#allocation3], %s270_s17  ;;  %s1955_s13 = int_to_ptr.vmem [resolvable:$true] %s1057_s13 }
  0x1a   : > { %1238 = vmatmul.mubr.msk.f32.vlgmr.msra.gmra.mrb[0].mxu0 %vm305_vm0, %v281_v15  ;;  %1388 = vmatpush3.bf16.msra.mxu1 %v1385_v11  ;;  %v286_v24 = vld [vmem:[%s1729_s20 + $0x30] sm:$0xff]  ;;  %v287_v27 = vld [vmem:[%s1729_s20 + $0x38] sm:$0xff]  ;;  %v288_v29 = vld [vmem:[%s1729_s20 + $0x40] sm:$0xff]  ;;  %p1553_p0 = scmp.lt.s32.totalorder %s1955_s13, %s1551_s19 }
  0x1b   : > { %1240 = vmatprep.mubr.msk.f32.mxu0 %vm305_vm0, %v282_v16  ;;  %1390 = vmatprep.subr.bf16.mxu1 %v1389_v18  ;;  %v289_v32 = vld [vmem:[%s1729_s20 + $0x48] sm:$0xff]  ;;  %v290_v34 = vld [vmem:[%s1729_s20 + $0x50] sm:$0xff]  ;;  %v291_v35 = vld [vmem:[%s1729_s20 + $0x58] sm:$0xff] }
  0x1c   : > { %v292_v36 = vld [vmem:[%s1729_s20 + $0x60] sm:$0xff]  ;;  %v293_v37 = vld [vmem:[%s1729_s20 + $0x68] sm:$0xff]  ;;  %v294_v38 = vld [vmem:[%s1729_s20 + $0x70] sm:$0xff]  ;;  %1412 = vmatpush3.bf16.msra.mxu0 %v1409_v46 }
  0x1d   : > { %v295_v39 = vld [vmem:[%s1729_s20 + $0x78] sm:$0xff]  ;;  %1414 = vmatprep.subr.bf16.mxu0 %v1413_v48  ;;  %v1126_v0 = vld [vmem:[%s2005_s2] ss:$0 sm:$0xff]  ;;  %s1546_s20 = scalar_lea.vmem %s1955_s13, 2048 }
  0x1e   : > { %1241 = vmatmul.mubr.msk.f32.gmra.mrb[2].mxu0 %vm305_vm0, %v283_v17  ;;  %1392 = vmatpush3.bf16.msra.mxu1 %v1389_v18  ;;  %v714_v50 = vld [vmem:[%s2008_s5 + $0x78] sm:$0xff]  ;;  %v1143_v52 = vld [vmem:[%s2007_s4] ss:$0 sm:$0xff]  ;;  %p1547_p11 = scmp.ne.s32.totalorder %s1955_s13, %s1546_s20  ;;  %p1554_p1 = scmp.lt.s32.totalorder %s1552_s21, %s1546_s20 }
  0x1f   : > { %1243 = vmatprep.mubr.msk.f32.mxu0 %vm305_vm0, %v284_v19  ;;  %1394 = vmatprep.subr.bf16.mxu1 %v1393_v23 }
  0x20   : > { %1416 = vmatpush3.bf16.msra.mxu0 %v1413_v48  ;;  %p1548_p12 = pnand %p1547_p11, %p1691_p5  ;;  %p1555_p2 = por %p1554_p1, %p1553_p0 }
  0x21   : > { %1418 = vmatprep.subr.bf16.mxu0 %v1417_v51 }
  0x22   : > { %1244 = vmatmul.mubr.msk.f32.gmra.mrb[4].mxu0 %vm305_vm0, %v285_v22  ;;  %1396 = vmatpush3.bf16.msra.mxu1 %v1393_v23  ;;  %p1549_p13 = pneg %p1548_p12 }
  0x23   : > { %1246 = vmatprep.mubr.msk.f32.mxu0 %vm305_vm0, %v286_v24  ;;  %1398 = vmatprep.subr.bf16.mxu1 %v1397_v28 }
  0x24   : > { %1420 = vmatpush3.bf16.msra.mxu0 %v1417_v51  ;;  %v1437_v51 = vpack.c.bf16 %v714_v50, %v713_v49  ;;  %p1556_p3 = pnand %p1555_p2, %p1549_p13 }
  0x25   : > { %1422 = vmatprep.subr.bf16.mxu0 %v1421_v54 }
  0x26   : > { %1247 = vmatmul.mubr.msk.f32.gmra.mrb[6].mxu0 %vm305_vm0, %v287_v27  ;;  %1400 = vmatpush3.bf16.msra.mxu1 %v1397_v28 }
  0x27   : > { %1249 = vmatprep.mubr.msk.f32.mxu0 %vm305_vm0, %v288_v29  ;;  %1402 = vmatprep.subr.bf16.mxu1 %v1401_v33 }
  0x28   : > { %1424 = vmatpush3.bf16.msra.mxu0 %v1421_v54 }
  0x29   : > { %1426 = vmatprep.subr.bf16.mxu0 %v1425_v57 }
  0x2a   : > { %1250 = vmatmul.mubr.msk.f32.gmra.mrb[8].mxu0 %vm305_vm0, %v289_v32  ;;  %1404 = vmatpush3.bf16.msra.mxu1 %v1401_v33 }
  0x2b   : > { %1252 = vmatprep.mubr.msk.f32.mxu0 %vm305_vm0, %v290_v34  ;;  %1406 = vmatprep.subr.bf16.mxu1 %v1405_v42 }
  0x2c   : > { %1428 = vmatpush3.bf16.msra.mxu0 %v1425_v57 }
  0x2d   : > { %1430 = vmatprep.subr.bf16.mxu0 %v1429_v60 }
  0x2e   : > { %1253 = vmatmul.mubr.msk.f32.gmra.mrb[10].mxu0 %vm305_vm0, %v291_v35  ;;  %1408 = vmatpush3.bf16.msra.mxu1 %v1405_v42 }
  0x2f   : > { %1255 = vmatprep.mubr.msk.f32.mxu0 %vm305_vm0, %v292_v36 }
  0x30   : > { %1432 = vmatpush3.bf16.msra.mxu0 %v1429_v60 }
  0x31   : > { %1434 = vmatprep.subr.bf16.mxu0 %v1433_v63 }
  0x32   : > { %1256 = vmatmul.mubr.msk.f32.gmra.mrb[12].mxu0 %vm305_vm0, %v293_v37 }
  0x33   : > { %1258 = vmatprep.mubr.msk.f32.mxu0 %vm305_vm0, %v294_v38 }
  0x34   : > { %1436 = vmatpush3.bf16.msra.mxu0 %v1433_v63 }
  0x35   : > { %1438 = vmatprep.subr.bf16.mxu0 %v1437_v51 }
  0x36   : > { %1259 = vmatmul.mubr.msk.f32.gmra.mrb[14].mxu0 %vm305_vm0, %v295_v39 }
  0x38   : > { %1440 = vmatpush3.bf16.msra.mxu0 %v1437_v51 }
  0xed   : > { %v1239_v1 = vpop.f32.mrb[0].mxu0 }
  0xee   : > { %v426_v2 = vadd.f32 %v1239_v1, %v1126_v0  ;;  %v420_v3 = vpop.f32.mrb[1].mxu0 }
  0xef   : > { %v421_v4 = vadd.f32 %v1126_v0, %v420_v3 }
  0xf0   : > { %v500_v7 = vmax.f32 %v426_v2, 0.0 }
  0xf1   : > { %v1242_v5 = vpop.f32.mrb[2].mxu0  ;;  %v499_v6 = vmax.f32 %v421_v4, 0.0 }
  0xf2   : > { %v436_v8 = vadd.f32 %v1242_v5, %v1126_v0  ;;  %v430_v9 = vpop.f32.mrb[3].mxu0 }
  0xf3   : > { %v431_v10 = vadd.f32 %v1126_v0, %v430_v9  ;;  %1293 = vmatprep.mubr.f32.mxu1 %v499_v6 }
  0xf4   : > { %1294 = vmatmul.mubr.f32.vlgmr.msra.gmra.mrb[0].mxu1 %v500_v7  ;;  %v502_v13 = vmax.f32 %v436_v8, 0.0 }
  0xf5   : > { %v501_v11 = vmax.f32 %v431_v10, 0.0  ;;  %v1245_v12 = vpop.f32.mrb[4].mxu0 }
  0xf6   : > { %v446_v14 = vadd.f32 %v1245_v12, %v1126_v0  ;;  %v440_v15 = vpop.f32.mrb[5].mxu0 }
  0xf7   : > { %v441_v16 = vadd.f32 %v1126_v0, %v440_v15  ;;  %1296 = vmatprep.mubr.f32.mxu1 %v501_v11 }
  0xf8   : > { %v504_v17 = vmax.f32 %v446_v14, 0.0  ;;  %1297 = vmatmul.mubr.f32.gmra.mrb[2].mxu1 %v502_v13 }
  0xf9   : > { %v503_v18 = vmax.f32 %v441_v16, 0.0  ;;  %v1248_v19 = vpop.f32.mrb[6].mxu0 }
  0xfa   : > { %v456_v20 = vadd.f32 %v1248_v19, %v1126_v0  ;;  %v450_v21 = vpop.f32.mrb[7].mxu0 }
  0xfb   : > { %v451_v22 = vadd.f32 %v1126_v0, %v450_v21  ;;  %1299 = vmatprep.mubr.f32.mxu1 %v503_v18 }
  0xfc   : > { %v506_v23 = vmax.f32 %v456_v20, 0.0  ;;  %1300 = vmatmul.mubr.f32.gmra.mrb[4].mxu1 %v504_v17 }
  0xfd   : > { %v505_v24 = vmax.f32 %v451_v22, 0.0  ;;  %v1251_v25 = vpop.f32.mrb[8].mxu0 }
  0xfe   : > { %v466_v26 = vadd.f32 %v1251_v25, %v1126_v0  ;;  %v460_v27 = vpop.f32.mrb[9].mxu0 }
  0xff   : > { %v461_v28 = vadd.f32 %v1126_v0, %v460_v27  ;;  %1302 = vmatprep.mubr.f32.mxu1 %v505_v24 }
 0x100   : > { %v508_v29 = vmax.f32 %v466_v26, 0.0  ;;  %1303 = vmatmul.mubr.f32.gmra.mrb[6].mxu1 %v506_v23 }
 0x101   : > { %v507_v30 = vmax.f32 %v461_v28, 0.0  ;;  %v1254_v31 = vpop.f32.mrb[10].mxu0 }
 0x102   : > { %v476_v32 = vadd.f32 %v1254_v31, %v1126_v0  ;;  %v470_v33 = vpop.f32.mrb[11].mxu0 }
 0x103   : > { %v471_v34 = vadd.f32 %v1126_v0, %v470_v33  ;;  %1305 = vmatprep.mubr.f32.mxu1 %v507_v30 }
 0x104   : > { %v510_v35 = vmax.f32 %v476_v32, 0.0  ;;  %1306 = vmatmul.mubr.f32.gmra.mrb[8].mxu1 %v508_v29 }
 0x105   : > { %v509_v36 = vmax.f32 %v471_v34, 0.0  ;;  %v1257_v37 = vpop.f32.mrb[12].mxu0 }
 0x106   : > { %v486_v38 = vadd.f32 %v1257_v37, %v1126_v0  ;;  %v480_v39 = vpop.f32.mrb[13].mxu0  ;;  %v1144_v37 = vld [vmem:[%s2009_s6] ss:$0 sm:$0xff] }
 0x107   : > { %v481_v40 = vadd.f32 %v1126_v0, %v480_v39  ;;  %1308 = vmatprep.mubr.f32.mxu1 %v509_v36 }
 0x108   : > { %v512_v41 = vmax.f32 %v486_v38, 0.0  ;;  %1309 = vmatmul.mubr.f32.gmra.mrb[10].mxu1 %v510_v35 }
 0x109   : > { %v511_v42 = vmax.f32 %v481_v40, 0.0  ;;  %v1260_v43 = vpop.f32.mrb[14].mxu0 }
 0x10a   : > { %v496_v44 = vadd.f32 %v1260_v43, %v1126_v0  ;;  %v490_v45 = vpop.f32.mrb[15].mxu0 }
 0x10b   : > { %v491_v46 = vadd.f32 %v1126_v0, %v490_v45  ;;  %1311 = vmatprep.mubr.f32.mxu1 %v511_v42 }
 0x10c   : > { %v514_v47 = vmax.f32 %v496_v44, 0.0  ;;  %1312 = vmatmul.mubr.f32.gmra.mrb[12].mxu1 %v512_v41 }
 0x10d   : > { %v513_v48 = vmax.f32 %v491_v46, 0.0 }
 0x10f   : > { %1314 = vmatprep.mubr.f32.mxu1 %v513_v48 }
 0x110   : > { %1315 = vmatmul.mubr.f32.gmra.mrb[14].mxu1 %v514_v47 }
 0x1c7   : > { %v1295_v53 = vpop.f32.mrb[0].mxu1 }
 0x1c8   : > { %v610_v54 = vadd.f32 %v1295_v53, %v1143_v52  ;;  %v604_v55 = vpop.f32.mrb[1].mxu1 }
 0x1c9   : > { %v605_v56 = vadd.f32 %v1143_v52, %v604_v55 }
 0x1ca   : > { %v684_v59 = vmax.f32 %v610_v54, 0.0 }
 0x1cb   : > { %v683_v57 = vmax.f32 %v605_v56, 0.0  ;;  %v1298_v58 = vpop.f32.mrb[2].mxu1 }
 0x1cc   : > { %v620_v60 = vadd.f32 %v1298_v58, %v1143_v52  ;;  %v614_v61 = vpop.f32.mrb[3].mxu1 }
 0x1cd   : > { %v615_v62 = vadd.f32 %v1143_v52, %v614_v61  ;;  %1349 = vmatprep.mubr.f32.mxu0 %v683_v57 }
 0x1ce   : > { %1350 = vmatmul.mubr.f32.vlgmr.msra.gmra.mrb[16].mxu0 %v684_v59  ;;  %v686_v1 = vmax.f32 %v620_v60, 0.0 }
 0x1cf   : > { %v685_v63 = vmax.f32 %v615_v62, 0.0  ;;  %v1301_v0 = vpop.f32.mrb[4].mxu1 }
 0x1d0   : > { %v630_v2 = vadd.f32 %v1301_v0, %v1143_v52  ;;  %v624_v3 = vpop.f32.mrb[5].mxu1 }
 0x1d1   : > { %v625_v4 = vadd.f32 %v1143_v52, %v624_v3  ;;  %1352 = vmatprep.mubr.f32.mxu0 %v685_v63 }
 0x1d2   : > { %v688_v5 = vmax.f32 %v630_v2, 0.0  ;;  %1353 = vmatmul.mubr.f32.gmra.mrb[18].mxu0 %v686_v1 }
 0x1d3   : > { %v687_v6 = vmax.f32 %v625_v4, 0.0  ;;  %v1304_v7 = vpop.f32.mrb[6].mxu1 }
 0x1d4   : > { %v640_v8 = vadd.f32 %v1304_v7, %v1143_v52  ;;  %v634_v9 = vpop.f32.mrb[7].mxu1 }
 0x1d5   : > { %v635_v10 = vadd.f32 %v1143_v52, %v634_v9  ;;  %1355 = vmatprep.mubr.f32.mxu0 %v687_v6 }
 0x1d6   : > { %v690_v11 = vmax.f32 %v640_v8, 0.0  ;;  %1356 = vmatmul.mubr.f32.gmra.mrb[20].mxu0 %v688_v5 }
 0x1d7   : > { %v689_v12 = vmax.f32 %v635_v10, 0.0  ;;  %v1307_v13 = vpop.f32.mrb[8].mxu1 }
 0x1d8   : > { %v650_v14 = vadd.f32 %v1307_v13, %v1143_v52  ;;  %v644_v15 = vpop.f32.mrb[9].mxu1 }
 0x1d9   : > { %v645_v16 = vadd.f32 %v1143_v52, %v644_v15  ;;  %1358 = vmatprep.mubr.f32.mxu0 %v689_v12 }
 0x1da   : > { %v692_v17 = vmax.f32 %v650_v14, 0.0  ;;  %1359 = vmatmul.mubr.f32.gmra.mrb[22].mxu0 %v690_v11 }
 0x1db   : > { %v691_v18 = vmax.f32 %v645_v16, 0.0  ;;  %v1310_v19 = vpop.f32.mrb[10].mxu1 }
 0x1dc   : > { %v660_v20 = vadd.f32 %v1310_v19, %v1143_v52  ;;  %v654_v21 = vpop.f32.mrb[11].mxu1 }
 0x1dd   : > { %v655_v22 = vadd.f32 %v1143_v52, %v654_v21  ;;  %1361 = vmatprep.mubr.f32.mxu0 %v691_v18 }
 0x1de   : > { %v694_v23 = vmax.f32 %v660_v20, 0.0  ;;  %1362 = vmatmul.mubr.f32.gmra.mrb[24].mxu0 %v692_v17 }
 0x1df   : > { %v693_v24 = vmax.f32 %v655_v22, 0.0  ;;  %v1313_v25 = vpop.f32.mrb[12].mxu1 }
 0x1e0   : > { %v670_v26 = vadd.f32 %v1313_v25, %v1143_v52  ;;  %v664_v27 = vpop.f32.mrb[13].mxu1 }
 0x1e1   : > { %v665_v28 = vadd.f32 %v1143_v52, %v664_v27  ;;  %1364 = vmatprep.mubr.f32.mxu0 %v693_v24 }
 0x1e2   : > { %v696_v29 = vmax.f32 %v670_v26, 0.0  ;;  %1365 = vmatmul.mubr.f32.gmra.mrb[26].mxu0 %v694_v23 }
 0x1e3   : > { %v695_v30 = vmax.f32 %v665_v28, 0.0  ;;  %v1316_v31 = vpop.f32.mrb[14].mxu1 }
 0x1e4   : > { %v680_v32 = vadd.f32 %v1316_v31, %v1143_v52  ;;  %v674_v33 = vpop.f32.mrb[15].mxu1 }
 0x1e5   : > { %v675_v34 = vadd.f32 %v1143_v52, %v674_v33  ;;  %1367 = vmatprep.mubr.f32.mxu0 %v695_v30 }
 0x1e6   : > { %v698_v35 = vmax.f32 %v680_v32, 0.0  ;;  %1368 = vmatmul.mubr.f32.gmra.mrb[28].mxu0 %v696_v29 }
 0x1e7   : > { %v697_v36 = vmax.f32 %v675_v34, 0.0 }
 0x1e9   : > { %1370 = vmatprep.mubr.f32.mxu0 %v697_v36 }
 0x1ea   : > { %1371 = vmatmul.mubr.f32.gmra.mrb[30].mxu0 %v698_v35 }
 0x2a1   : > { %v1351_v38 = vpop.f32.mrb[16].mxu0 }
 0x2a2   : > { %v794_v39 = vadd.f32 %v1351_v38, %v1144_v37  ;;  %v788_v40 = vpop.f32.mrb[17].mxu0 }
 0x2a3   : > { %v789_v42 = vadd.f32 %v1144_v37, %v788_v40 }
 0x2a4   : > { %869 = vmax.xlane.f32.xlu0 %v794_v39 }
 0x2a5   : > { %v1354_v41 = vpop.f32.mrb[18].mxu0 }
 0x2a6   : > { %v804_v43 = vadd.f32 %v1354_v41, %v1144_v37  ;;  %v798_v44 = vpop.f32.mrb[19].mxu0 }
 0x2a7   : > { %v799_v46 = vadd.f32 %v1144_v37, %v798_v44 }
 0x2a8   : > { %873 = vmax.xlane.f32.xlu1 %v804_v43  ;;  %867 = vmax.xlane.f32.xlu0 %v789_v42 }
 0x2a9   : > { %v1357_v45 = vpop.f32.mrb[20].mxu0 }
 0x2aa   : > { %v808_v47 = vpop.f32.mrb[21].mxu0  ;;  %v814_v50 = vadd.f32 %v1357_v45, %v1144_v37 }
 0x2ab   : > { %v809_v48 = vadd.f32 %v1144_v37, %v808_v47 }
 0x2ac   : > { %871 = vmax.xlane.f32.xlu1 %v799_v46 }
 0x2ad   : > { %v1360_v49 = vpop.f32.mrb[22].mxu0  ;;  %875 = vmax.xlane.f32.xlu0 %v809_v48 }
 0x2ae   : > { %v818_v51 = vpop.f32.mrb[23].mxu0  ;;  %v824_v54 = vadd.f32 %v1360_v49, %v1144_v37 }
 0x2af   : > { %v819_v52 = vadd.f32 %v1144_v37, %v818_v51 }
 0x2b0   : > { %877 = vmax.xlane.f32.xlu1 %v814_v50 }
 0x2b1   : > { %v1363_v53 = vpop.f32.mrb[24].mxu0  ;;  %879 = vmax.xlane.f32.xlu0 %v819_v52 }
 0x2b2   : > { %v828_v55 = vpop.f32.mrb[25].mxu0  ;;  %v834_v58 = vadd.f32 %v1363_v53, %v1144_v37 }
 0x2b3   : > { %v829_v56 = vadd.f32 %v1144_v37, %v828_v55 }
 0x2b4   : > { %881 = vmax.xlane.f32.xlu1 %v824_v54 }
 0x2b5   : > { %v1366_v57 = vpop.f32.mrb[26].mxu0  ;;  %883 = vmax.xlane.f32.xlu0 %v829_v56 }
 0x2b6   : > { %v838_v59 = vpop.f32.mrb[27].mxu0  ;;  %v844_v62 = vadd.f32 %v1366_v57, %v1144_v37 }
 0x2b7   : > { %v839_v60 = vadd.f32 %v1144_v37, %v838_v59 }
 0x2b8   : > { %885 = vmax.xlane.f32.xlu1 %v834_v58 }
 0x2b9   : > { %v1369_v61 = vpop.f32.mrb[28].mxu0  ;;  %887 = vmax.xlane.f32.xlu0 %v839_v60 }
 0x2ba   : > { %v848_v63 = vpop.f32.mrb[29].mxu0  ;;  %v1853_v2 = vadd.f32 %v1369_v61, %v1144_v37 }
 0x2bb   : > { %v1850_v0 = vadd.f32 %v1144_v37, %v848_v63 }
 0x2bc   : > { %889 = vmax.xlane.f32.xlu1 %v844_v62 }
 0x2bd   : > { %v1372_v1 = vpop.f32.mrb[30].mxu0  ;;  %891 = vmax.xlane.f32.xlu0 %v1850_v0 }
 0x2be   : > { %v858_v3 = vpop.f32.mrb[31].mxu0  ;;  %v1859_v5 = vadd.f32 %v1372_v1, %v1144_v37 }
 0x2bf   : > { %v1855_v4 = vadd.f32 %v1144_v37, %v858_v3 }
 0x2c0   : > { %893 = vmax.xlane.f32.xlu1 %v1853_v2 }
 0x2c1   : > { %895 = vmax.xlane.f32.xlu0 %v1855_v4 }
 0x2c4   : > { %897 = vmax.xlane.f32.xlu1 %v1859_v5 }
 0x331   : > { %v870_v6 = vpop.xlane.xlu0 %869 }
 0x332   : > { %v1862_v7 = vsub.f32 %v794_v39, %v870_v6 }
 0x334   : > { %v917_v8 = vmul.f32 1.442695, %v1862_v7 }
 0x335   : > { %v874_v9 = vpop.xlane.xlu1 %873  ;;  %v868_v10 = vpop.xlane.xlu0 %867 }
 0x336   : > { %1482 = vpow2.f32 %v917_v8  ;;  %v1865_v11 = vsub.f32 %v804_v43, %v874_v9  ;;  %v1867_v12 = vsub.f32 %v789_v42, %v868_v10 }
 0x338   : > { %v921_v13 = vmul.f32 1.442695, %v1865_v11  ;;  %v915_v14 = vmul.f32 1.442695, %v1867_v12 }
 0x339   : > { %v872_v15 = vpop.xlane.xlu1 %871 }
 0x33a   : > { %1484 = vpow2.f32 %v921_v13  ;;  %v1871_v16 = vsub.f32 %v799_v46, %v872_v15  ;;  %v876_v17 = vpop.xlane.xlu0 %875 }
 0x33b   : > { %1486 = vpow2.f32 %v915_v14  ;;  %v1873_v18 = vsub.f32 %v809_v48, %v876_v17 }
 0x33c   : > { %v919_v19 = vmul.f32 1.442695, %v1871_v16 }
 0x33d   : > { %v878_v20 = vpop.xlane.xlu1 %877  ;;  %v923_v23 = vmul.f32 1.442695, %v1873_v18 }
 0x33e   : > { %1488 = vpow2.f32 %v919_v19  ;;  %v1876_v21 = vsub.f32 %v814_v50, %v878_v20  ;;  %v880_v22 = vpop.xlane.xlu0 %879 }
 0x33f   : > { %v1879_v24 = vsub.f32 %v819_v52, %v880_v22 }
 0x340   : > { %v1483_v25 = vpop.eup %1482  ;;  %v925_v26 = vmul.f32 1.442695, %v1876_v21 }
 0x341   : > { %949 = vadd.xlane.f32.xlu1 %v1483_v25  ;;  %v882_v27 = vpop.xlane.xlu1 %881  ;;  %v927_v30 = vmul.f32 1.442695, %v1879_v24 }
 0x342   : > { %1490 = vpow2.f32 %v925_v26  ;;  %v1882_v28 = vsub.f32 %v824_v54, %v882_v27  ;;  %v884_v29 = vpop.xlane.xlu0 %883 }
 0x343   : > { %1492 = vpow2.f32 %v923_v23  ;;  %v1885_v31 = vsub.f32 %v829_v56, %v884_v29 }
 0x344   : > { %v1485_v32 = vpop.eup %1484  ;;  %v929_v33 = vmul.f32 1.442695, %v1882_v28 }
 0x345   : > { %v1487_v34 = vpop.eup %1486  ;;  %953 = vadd.xlane.f32.xlu1 %v1485_v32  ;;  %v886_v35 = vpop.xlane.xlu1 %885  ;;  %v931_v38 = vmul.f32 1.442695, %v1885_v31 }
 0x346   : > { %1494 = vpow2.f32 %v929_v33  ;;  %v1888_v36 = vsub.f32 %v834_v58, %v886_v35  ;;  %947 = vadd.xlane.f32.xlu0 %v1487_v34  ;;  %v888_v37 = vpop.xlane.xlu0 %887 }
 0x347   : > { %1496 = vpow2.f32 %v927_v30  ;;  %v1891_v39 = vsub.f32 %v839_v60, %v888_v37 }
 0x348   : > { %v1489_v40 = vpop.eup %1488  ;;  %v933_v41 = vmul.f32 1.442695, %v1888_v36 }
 0x349   : > { %v890_v42 = vpop.xlane.xlu1 %889  ;;  %v935_v45 = vmul.f32 1.442695, %v1891_v39 }
 0x34a   : > { %1498 = vpow2.f32 %v933_v41  ;;  %v1894_v43 = vsub.f32 %v844_v62, %v890_v42  ;;  %951 = vadd.xlane.f32.xlu0 %v1489_v40  ;;  %v892_v44 = vpop.xlane.xlu0 %891 }
 0x34b   : > { %1500 = vpow2.f32 %v931_v38  ;;  %v1898_v46 = vsub.f32 %v1850_v0, %v892_v44 }
 0x34c   : > { %v1491_v47 = vpop.eup %1490  ;;  %v937_v48 = vmul.f32 1.442695, %v1894_v43 }
 0x34d   : > { %v1493_v49 = vpop.eup %1492  ;;  %957 = vadd.xlane.f32.xlu1 %v1491_v47  ;;  %v894_v50 = vpop.xlane.xlu1 %893  ;;  %v939_v53 = vmul.f32 1.442695, %v1898_v46 }
 0x34e   : > { %1502 = vpow2.f32 %v937_v48  ;;  %v1902_v51 = vsub.f32 %v1853_v2, %v894_v50  ;;  %955 = vadd.xlane.f32.xlu0 %v1493_v49  ;;  %v896_v52 = vpop.xlane.xlu0 %895 }
 0x34f   : > { %1504 = vpow2.f32 %v935_v45  ;;  %v1906_v54 = vsub.f32 %v1855_v4, %v896_v52 }
 0x350   : > { %v1495_v55 = vpop.eup %1494  ;;  %v941_v56 = vmul.f32 1.442695, %v1902_v51 }
 0x351   : > { %v1497_v57 = vpop.eup %1496  ;;  %961 = vadd.xlane.f32.xlu1 %v1495_v55  ;;  %v898_v58 = vpop.xlane.xlu1 %897  ;;  %v943_v60 = vmul.f32 1.442695, %v1906_v54 }
 0x352   : > { %1506 = vpow2.f32 %v941_v56  ;;  %v1910_v59 = vsub.f32 %v1859_v5, %v898_v58  ;;  %959 = vadd.xlane.f32.xlu0 %v1497_v57 }
 0x353   : > { %1508 = vpow2.f32 %v939_v53 }
 0x354   : > { %v1499_v61 = vpop.eup %1498  ;;  %v945_v62 = vmul.f32 1.442695, %v1910_v59 }
 0x355   : > { %v1501_v63 = vpop.eup %1500  ;;  %965 = vadd.xlane.f32.xlu1 %v1499_v61 }
 0x356   : > { %1510 = vpow2.f32 %v945_v62  ;;  %963 = vadd.xlane.f32.xlu0 %v1501_v63 }
 0x357   : > { %1512 = vpow2.f32 %v943_v60 }
 0x358   : > { %v1503_v0 = vpop.eup %1502 }
 0x359   : > { %v1505_v1 = vpop.eup %1504  ;;  %969 = vadd.xlane.f32.xlu1 %v1503_v0 }
 0x35a   : > { %967 = vadd.xlane.f32.xlu0 %v1505_v1 }
 0x35c   : > { %v1507_v2 = vpop.eup %1506 }
 0x35d   : > { %v1509_v3 = vpop.eup %1508  ;;  %973 = vadd.xlane.f32.xlu1 %v1507_v2 }
 0x35e   : > { %971 = vadd.xlane.f32.xlu0 %v1509_v3 }
 0x360   : > { %v1511_v4 = vpop.eup %1510 }
 0x361   : > { %v1513_v5 = vpop.eup %1512  ;;  %977 = vadd.xlane.f32.xlu1 %v1511_v4 }
 0x362   : > { %975 = vadd.xlane.f32.xlu0 %v1513_v5 }
 0x3ce   : > { %v950_v6 = vpop.xlane.xlu1 %949 }
 0x3cf   : > { %1514 = vlog2.f32 %v950_v6 }
 0x3d2   : > { %v954_v8 = vpop.xlane.xlu1 %953 }
 0x3d3   : > { %1516 = vlog2.f32 %v954_v8  ;;  %v948_v9 = vpop.xlane.xlu0 %947 }
 0x3d4   : > { %1518 = vlog2.f32 %v948_v9 }
 0x3d7   : > { %v952_v10 = vpop.xlane.xlu0 %951 }
 0x3d8   : > { %1520 = vlog2.f32 %v952_v10 }
 0x3d9   : > { %v1515_v13 = vpop.eup %1514 }
 0x3da   : > { %v982_v14 = vmul.f32 0.6931472, %v1515_v13  ;;  %v958_v15 = vpop.xlane.xlu1 %957 }
 0x3db   : > { %1522 = vlog2.f32 %v958_v15  ;;  %v956_v17 = vpop.xlane.xlu0 %955 }
 0x3dc   : > { %v1012_v19 = vsub.f32 %v1862_v7, %v982_v14  ;;  %1524 = vlog2.f32 %v956_v17 }
 0x3dd   : > { %v1517_v20 = vpop.eup %1516 }
 0x3de   : > { %v1519_v22 = vpop.eup %1518  ;;  %1028 = vst [vmem:[%s1918_s8 + $0x8] sm:$0xff] %v1012_v19  ;;  %v986_v23 = vmul.f32 0.6931472, %v1517_v20  ;;  %v962_v25 = vpop.xlane.xlu1 %961 }
 0x3df   : > { %v980_v26 = vmul.f32 0.6931472, %v1519_v22  ;;  %1526 = vlog2.f32 %v962_v25  ;;  %v960_v27 = vpop.xlane.xlu0 %959 }
 0x3e0   : > { %v1014_v29 = vsub.f32 %v1865_v11, %v986_v23  ;;  %1528 = vlog2.f32 %v960_v27 }
 0x3e1   : > { %v1011_v7 = vsub.f32 %v1867_v12, %v980_v26 }
 0x3e2   : > { %v1521_v30 = vpop.eup %1520  ;;  %1030 = vst [vmem:[%s1918_s8 + $0x18] sm:$0xff] %v1014_v29  ;;  %v966_v32 = vpop.xlane.xlu1 %965 }
 0x3e3   : > { %1027 = vst [vmem:[%s1918_s8] sm:$0xff] %v1011_v7  ;;  %v984_v33 = vmul.f32 0.6931472, %v1521_v30  ;;  %1530 = vlog2.f32 %v966_v32  ;;  %v964_v34 = vpop.xlane.xlu0 %963 }
 0x3e4   : > { %1532 = vlog2.f32 %v964_v34 }
 0x3e5   : > { %v1523_v35 = vpop.eup %1522  ;;  %v1013_v37 = vsub.f32 %v1871_v16, %v984_v33 }
 0x3e6   : > { %v1525_v38 = vpop.eup %1524  ;;  %v990_v40 = vmul.f32 0.6931472, %v1523_v35  ;;  %v970_v11 = vpop.xlane.xlu1 %969 }
 0x3e7   : > { %1029 = vst [vmem:[%s1918_s8 + $0x10] sm:$0xff] %v1013_v37  ;;  %v988_v41 = vmul.f32 0.6931472, %v1525_v38  ;;  %1534 = vlog2.f32 %v970_v11  ;;  %v968_v12 = vpop.xlane.xlu0 %967 }
 0x3e8   : > { %v1016_v42 = vsub.f32 %v1876_v21, %v990_v40  ;;  %1536 = vlog2.f32 %v968_v12 }
 0x3e9   : > { %v1527_v44 = vpop.eup %1526  ;;  %v1015_v45 = vsub.f32 %v1873_v18, %v988_v41 }
 0x3ea   : > { %v1529_v47 = vpop.eup %1528  ;;  %1032 = vst [vmem:[%s1918_s8 + $0x28] sm:$0xff] %v1016_v42  ;;  %v994_v48 = vmul.f32 0.6931472, %v1527_v44  ;;  %v974_v16 = vpop.xlane.xlu1 %973 }
 0x3eb   : > { %1031 = vst [vmem:[%s1918_s8 + $0x20] sm:$0xff] %v1015_v45  ;;  %v992_v49 = vmul.f32 0.6931472, %v1529_v47  ;;  %1538 = vlog2.f32 %v974_v16  ;;  %v972_v50 = vpop.xlane.xlu0 %971 }
 0x3ec   : > { %v1018_v52 = vsub.f32 %v1882_v28, %v994_v48  ;;  %1540 = vlog2.f32 %v972_v50 }
 0x3ed   : > { %v1531_v53 = vpop.eup %1530  ;;  %v1017_v21 = vsub.f32 %v1879_v24, %v992_v49 }
 0x3ee   : > { %v1533_v55 = vpop.eup %1532  ;;  %1034 = vst [vmem:[%s1918_s8 + $0x38] sm:$0xff] %v1018_v52  ;;  %v998_v18 = vmul.f32 0.6931472, %v1531_v53  ;;  %v978_v56 = vpop.xlane.xlu1 %977 }
 0x3ef   : > { %1033 = vst [vmem:[%s1918_s8 + $0x30] sm:$0xff] %v1017_v21  ;;  %v996_v57 = vmul.f32 0.6931472, %v1533_v55  ;;  %1542 = vlog2.f32 %v978_v56  ;;  %v976_v58 = vpop.xlane.xlu0 %975 }
 0x3f0   : > { %v1020_v60 = vsub.f32 %v1888_v36, %v998_v18  ;;  %1544 = vlog2.f32 %v976_v58 }
 0x3f1   : > { %v1535_v28 = vpop.eup %1534  ;;  %v1019_v61 = vsub.f32 %v1885_v31, %v996_v57 }
 0x3f2   : > { %v1537_v62 = vpop.eup %1536  ;;  %1036 = vst [vmem:[%s1918_s8 + $0x48] sm:$0xff] %v1020_v60  ;;  %v1002_v24 = vmul.f32 0.6931472, %v1535_v28 }
 0x3f3   : > { %1035 = vst [vmem:[%s1918_s8 + $0x40] sm:$0xff] %v1019_v61  ;;  %v1000_v63 = vmul.f32 0.6931472, %v1537_v62 }
 0x3f4   : > { %v1022_v0 = vsub.f32 %v1894_v43, %v1002_v24 }
 0x3f5   : > { %v1539_v1 = vpop.eup %1538  ;;  %v1021_v2 = vsub.f32 %v1891_v39, %v1000_v63 }
 0x3f6   : > { %v1541_v3 = vpop.eup %1540  ;;  %1038 = vst [vmem:[%s1918_s8 + $0x58] sm:$0xff] %v1022_v0  ;;  %v1006_v36 = vmul.f32 0.6931472, %v1539_v1 }
 0x3f7   : > { %1037 = vst [vmem:[%s1918_s8 + $0x50] sm:$0xff] %v1021_v2  ;;  %v1004_v31 = vmul.f32 0.6931472, %v1541_v3 }
 0x3f8   : > { %v1024_v4 = vsub.f32 %v1902_v51, %v1006_v36 }
 0x3f9   : > { %v1543_v5 = vpop.eup %1542  ;;  %v1023_v6 = vsub.f32 %v1898_v46, %v1004_v31 }
 0x3fa   : > { %v1545_v43 = vpop.eup %1544  ;;  %1040 = vst [vmem:[%s1918_s8 + $0x68] sm:$0xff] %v1024_v4  ;;  %v1010_v8 = vmul.f32 0.6931472, %v1543_v5 }
 0x3fb   : > { %1039 = vst [vmem:[%s1918_s8 + $0x60] sm:$0xff] %v1023_v6  ;;  %v1008_v39 = vmul.f32 0.6931472, %v1545_v43 }
 0x3fc   : > { %v1026_v9 = vsub.f32 %v1910_v59, %v1010_v8 }
 0x3fd   : > { %v1025_v46 = vsub.f32 %v1906_v54, %v1008_v39 }
 0x3fe   : > { %1042 = vst [vmem:[%s1918_s8 + $0x78] sm:$0xff] %v1026_v9 }
 0x3ff   : > { %1041 = vst [vmem:[%s1918_s8 + $0x70] sm:$0xff] %v1025_v46 }
 0x400   : > { %1559 = shalt.err (!%p1556_p3)
}
 0x401   : > { %s1560_s22 = scalar_lea.hbm %s1953_s16, 2048  ;;  %s1564_s29 = scalar_lea.hbm %s2010_s7, 4096 }
 0x402   : > { %p1561_p4 = scmp.ne.s32.totalorder %s1953_s16, %s1560_s22  ;;  %p1565_p9 = scmp.lt.u32.totalorder %s1953_s16, %s2010_s7 }
 0x403   : > { %p1566_p10 = scmp.lt.u32.totalorder %s1564_s29, %s1560_s22  ;;  %p1568_p12 = scmp.lt.u32.totalorder %s1560_s22, %s1953_s16 }
 0x404   : > { %p1562_p7 = pnand %p1561_p4, %p1691_p5 }
 0x405   : > { %p1567_p11 = por %p1566_p10, %p1565_p9 }
 0x406   : > { %p1563_p8 = pneg %p1562_p7 }
 0x407   : > { %p1569_p13 = por %p1568_p12, %p1567_p11 }
 0x409   : > { %p1570_p0 = pnand %p1569_p13, %p1563_p8 }
 0x40b   : > { %1573 = shalt.err (!%p1570_p0)
}
 0x40c   : > { %s1611_s14 = smov 128   ;;  %s1612_s15 = smov 8  }
 0x40d   : > { %1441 = dma.vmem_to_hbm [thread:$0]  (%p1691_p5), %s1955_s13, 2048, %s1953_s16, %s1962_s28, %s1611_s14, %s1611_s14, %s1612_s15  }
 0x40e PF: > { %p1447_p1 = scmp.ge.s32.totalorder %s1608_s27, 2  ;;  %s1072_s20 = sand.u32 1, %s1596_s24  }
 0x40f   : > { %s1073_s18 = scalar_lea.sflag [#allocation3], %s1072_s20 }
 0x410   : > { %p1444_p2 = pnand %p1447_p1, %p1695_p6 }
 0x412   : > { %1591 = dma.done.wait (!%p1444_p2), %s1073_s18, 2048  }
 0x413   : > { %1593 = vsyncadd (!%p1444_p2), %s1073_s18, 4294965248  ;;  %p17_p3 = scmp.ge.s32.totalorder %s1678_s30, 4   ;;  %s2013_s24 = smov %s1600_s25 }
 0x414   : > { %s2014_s25 = smov %s1604_s26  ;;  %s2015_s26 = smov %s1689_s10 }
 0x415   : > { %s2016_s27 = smov %s1678_s30  ;;  %19 = sbr.rel (!%p17_p3) target bundleno = 3 (0x3), region = 83 }
 0x41c   :  { %1078 = vsyncpa [#allocation3], 1 }
 0x41d   :  { %1080 = vsyncpa [#allocation3 + $0x1], 1 }

</bundles_post_ra>
